<compile_context>
chip_gen: v7x
topology: tpu7x:2x2x1
jax: 0.10.0
libtpu: 0.0.40
codegen_flags: <defaults>
</compile_context>

<pallas_src>
import functools

import jax
import jax.numpy as jnp
from jax.experimental import pallas as pl
from jax.experimental.pallas import tpu as pltpu


def _round_up(x: int, m: int) -> int:
    return ((x + m - 1) // m) * m


def _pick_vmem_limit() -> int:
    cap = 128 * 1024 * 1024
    try:
        cap = int(getattr(pltpu.get_tpu_info(), "vmem_capacity_bytes", cap))
    except Exception:
        pass
    # Leave headroom: ~96 MiB on v5e/v6e (128 MiB physical), ~48 MiB on v7x (64 MiB).
    return min(96 * 1024 * 1024, (cap * 3) // 4)


def _aspp_kernel(x_ref, wconv_ref, cbias_ref, scale_ref, shift_ref,
                 wproj_ref, pbias_ref, o_ref, im_ref, *, rates, pad, w_pad, c_in):
    """Fused ASPP forward for one image.

    x_ref    : (C_in, FL) bf16     zero-padded image, spatially flattened with
                                   row stride `w_pad` (pad = max(rates) / side).
    wconv_ref: (3*C_out, 27*C_in)  bf16 block-diagonal stacked 3x3 weights.
    cbias_ref: (3*C_out, 1) f32    conv biases (branch-major).
    scale_ref: (3*C_out, 1) f32    folded BN scale  gamma / sqrt(var + eps).
    shift_ref: (3*C_out, 1) f32    folded BN shift  beta - mean * scale.
    wproj_ref: (C_out, 3*C_out)    bf16 1x1 projection weight (concat order).
    pbias_ref: (C_out, 1) f32      projection bias.
    o_ref    : (C_out, L) f32      output in the same strided flat layout.
    im_ref   : (27*C_in, L) bf16   im2col scratch (VMEM).
    """
    l_acc = o_ref.shape[-1]

    # im2col: every (branch, tap) is a single contiguous lane slice of the
    # strided-flat padded image (output (h, w) lives at flat h*w_pad + w).
    # The 27-tap reduction then happens inside the MXU accumulator.
    for b, d in enumerate(rates):
        for ky in range(3):
            for kx in range(3):
                base = (pad + (ky - 1) * d) * w_pad + (pad + (kx - 1) * d)
                t = b * 9 + ky * 3 + kx
                im_ref[pl.ds(t * c_in, c_in), :] = x_ref[:, pl.ds(base, l_acc)]

    # All 3 dilated branches in ONE MXU matmul (block-diagonal weight).
    z = jnp.dot(wconv_ref[...], im_ref[...], preferred_element_type=jnp.float32)
    # conv bias + ReLU + folded inference BatchNorm, f32 epilogue (VPU).
    z = jnp.maximum(z + cbias_ref[...], 0.0)
    z = z * scale_ref[...] + shift_ref[...]
    # channel-concat + 1x1 projection == one (C_out, 3*C_out)@(3*C_out, L) matmul.
    proj = jnp.dot(wproj_ref[...], z.astype(jnp.bfloat16),
                   preferred_element_type=jnp.float32)
    o_ref[...] = (proj + pbias_ref[...]).astype(o_ref.dtype)


def aspp_forward(x, conv_w, conv_b, bn_gamma, bn_beta, bn_mean, bn_var,
                 proj_w, proj_b, *, rates=(6, 12, 18), eps=1e-5):
    """x: (N, C_in, H, W) f32 -> (N, C_out, H, W) f32, matching ASPP.forward."""
    N, C_in, H, W = x.shape
    n_rate = len(rates)
    C_out = conv_w.shape[1]
    P = max(rates)
    Hp, Wp = H + 2 * P, W + 2 * P

    # Strided-flat layout: output (h, w) lives at h*Wp + w, so every dilated
    # conv tap is one contiguous lane slice of the flattened padded input.
    L = _round_up(H * Wp, 128)                       # accumulator / output length
    base_max = 2 * P * Wp + 2 * P                    # largest tap offset
    fl_needed = base_max + L
    extra_rows = max(0, -(-(fl_needed - Hp * Wp) // Wp))
    FL = (Hp + extra_rows) * Wp                      # >= fl_needed

    # Single pad (already bf16) directly into the strided-flat layout; the
    # reshape afterwards is contiguous and free.
    x_flat = jnp.pad(x.astype(jnp.bfloat16),
                     ((0, 0), (0, 0), (P, P + extra_rows), (P, P))
                     ).reshape(N, C_in, FL)

    # Host-side weight prep (grid-invariant, hoisted out of the kernel).
    # Per branch: (C_out, 9*C_in) with columns ordered (ky, kx, ci), then a
    # block-diagonal (3*C_out, 27*C_in) matrix so one matmul does all branches.
    wb = jnp.transpose(conv_w, (0, 1, 3, 4, 2)).reshape(n_rate, C_out, 9 * C_in)
    wconv = jnp.zeros((n_rate * C_out, n_rate * 9 * C_in), jnp.float32)
    for b in range(n_rate):
        wconv = wconv.at[b * C_out:(b + 1) * C_out,
                         b * 9 * C_in:(b + 1) * 9 * C_in].set(wb[b])
    wconv = wconv.astype(jnp.bfloat16)

    cbias = conv_b.reshape(n_rate * C_out, 1).astype(jnp.float32)
    scale = (bn_gamma / jnp.sqrt(bn_var + eps)).astype(jnp.float32)
    shift = (bn_beta - bn_mean * scale).astype(jnp.float32)
    scale = scale.reshape(n_rate * C_out, 1)
    shift = shift.reshape(n_rate * C_out, 1)
    wproj = proj_w.astype(jnp.bfloat16)              # (C_out, 3*C_out), concat order
    pbias = proj_b.reshape(C_out, 1).astype(jnp.float32)

    flops = (2 * N * L * (n_rate * C_out) * (n_rate * 9 * C_in)
             + 2 * N * L * C_out * (n_rate * C_out))
    bytes_accessed = (2 * x_flat.size + 4 * N * C_out * L
                      + 2 * wconv.size + 2 * wproj.size
                      + 4 * (cbias.size + scale.size + shift.size + pbias.size))

    kernel = functools.partial(_aspp_kernel, rates=tuple(rates), pad=P,
                               w_pad=Wp, c_in=C_in)

    out_flat = pl.pallas_call(
        kernel,
        out_shape=jax.ShapeDtypeStruct((N, C_out, L), jnp.float32),
        grid_spec=pltpu.PrefetchScalarGridSpec(
            num_scalar_prefetch=0,
            grid=(N,),
            in_specs=[
                pl.BlockSpec((pl.Squeezed(), C_in, FL), lambda i: (i, 0, 0)),
                pl.BlockSpec((n_rate * C_out, n_rate * 9 * C_in), lambda i: (0, 0)),
                pl.BlockSpec((n_rate * C_out, 1), lambda i: (0, 0)),
                pl.BlockSpec((n_rate * C_out, 1), lambda i: (0, 0)),
                pl.BlockSpec((n_rate * C_out, 1), lambda i: (0, 0)),
                pl.BlockSpec((C_out, n_rate * C_out), lambda i: (0, 0)),
                pl.BlockSpec((C_out, 1), lambda i: (0, 0)),
            ],
            out_specs=pl.BlockSpec((pl.Squeezed(), C_out, L), lambda i: (i, 0, 0)),
            scratch_shapes=[pltpu.VMEM((n_rate * 9 * C_in, L), jnp.bfloat16)],
        ),
        compiler_params=pltpu.CompilerParams(
            dimension_semantics=("parallel",),
            vmem_limit_bytes=_pick_vmem_limit(),
        ),
        cost_estimate=pl.CostEstimate(
            flops=int(flops), transcendentals=0, bytes_accessed=int(bytes_accessed)),
    )(x_flat, wconv, cbias, scale, shift, wproj, pbias)

    # Un-stride the lane-dense output slab (layout plumbing only).
    out = out_flat[:, :, :H * Wp].reshape(N, C_out, H, Wp)[..., :W]
    return out


def aspp_reference(x, conv_w, conv_b, bn_gamma, bn_beta, bn_mean, bn_var,
                   proj_w, proj_b, *, rates=(6, 12, 18), eps=1e-5):
    """Pure-JAX f32 reference (lax dilated conv), same forward semantics."""
    branches = []
    for b, d in enumerate(rates):
        y = jax.lax.conv_general_dilated(
            x, conv_w[b], window_strides=(1, 1), padding=((d, d), (d, d)),
            rhs_dilation=(d, d), dimension_numbers=("NCHW", "OIHW", "NCHW"),
            precision=jax.lax.Precision.HIGHEST)
        y = y + conv_b[b][None, :, None, None]
        y = jnp.maximum(y, 0.0)
        s = bn_gamma[b] / jnp.sqrt(bn_var[b] + eps)
        t = bn_beta[b] - bn_mean[b] * s
        y = y * s[None, :, None, None] + t[None, :, None, None]
        branches.append(y)
    cat = jnp.concatenate(branches, axis=1)
    out = jnp.einsum("oc,nchw->nohw", proj_w, cat,
                     precision=jax.lax.Precision.HIGHEST)
    return out + proj_b[None, :, None, None]


if __name__ == "__main__":
    key = jax.random.PRNGKey(0)
    ks = jax.random.split(key, 9)

    N, C_in, C_out, H, W = 2, 8, 8, 16, 16
    rates = (6, 12, 18)

    x = jax.random.normal(ks[0], (N, C_in, H, W), dtype=jnp.float32)

    # Conv weights ~ kaiming normal (as in _init_weights).
    conv_w = jax.random.normal(ks[1], (len(rates), C_out, C_in, 3, 3),
                               dtype=jnp.float32) * jnp.sqrt(2.0 / (C_in * 9))
    conv_b = 0.1 * jax.random.normal(ks[2], (len(rates), C_out), dtype=jnp.float32)
    # Inference-mode BatchNorm params (perturbed so folded scale/shift is exercised).
    bn_gamma = 1.0 + 0.1 * jax.random.normal(ks[3], (len(rates), C_out), dtype=jnp.float32)
    bn_beta = 0.1 * jax.random.normal(ks[4], (len(rates), C_out), dtype=jnp.float32)
    bn_mean = 0.1 * jax.random.normal(ks[5], (len(rates), C_out), dtype=jnp.float32)
    bn_var = 1.0 + 0.2 * jax.random.uniform(ks[6], (len(rates), C_out), dtype=jnp.float32)
    # 1x1 projection conv.
    proj_w = jax.random.normal(ks[7], (C_out, len(rates) * C_out),
                               dtype=jnp.float32) * jnp.sqrt(2.0 / (len(rates) * C_out))
    proj_b = 0.1 * jax.random.normal(ks[8], (C_out,), dtype=jnp.float32)

    out = aspp_forward(x, conv_w, conv_b, bn_gamma, bn_beta, bn_mean, bn_var,
                       proj_w, proj_b, rates=rates)
    out = jax.block_until_ready(out)

    ref = aspp_reference(x, conv_w, conv_b, bn_gamma, bn_beta, bn_mean, bn_var,
                         proj_w, proj_b, rates=rates)

    assert out.shape == (N, C_out, H, W), out.shape
    max_err = float(jnp.max(jnp.abs(out - ref)))
    ref_scale = float(jnp.max(jnp.abs(ref)))
    # bf16 matmul operands with f32 accumulation -> mixed abs/rel tolerance.
    tol = 2e-2 * ref_scale + 2e-2
    assert max_err < tol, f"max abs error {max_err} (tol {tol})"
    print("KERNEL_OK")
</pallas_src>

<mosaic_0001>
module attributes {stable_mosaic.version = 11 : i64} {
  func.func @_aspp_kernel(%arg0: i32, %arg1: memref<1x8x2808xbf16, #tpu.memory_space<vmem>>, %arg2: memref<24x216xbf16, #tpu.memory_space<vmem>>, %arg3: memref<24x1xf32, #tpu.memory_space<vmem>>, %arg4: memref<24x1xf32, #tpu.memory_space<vmem>>, %arg5: memref<24x1xf32, #tpu.memory_space<vmem>>, %arg6: memref<8x24xbf16, #tpu.memory_space<vmem>>, %arg7: memref<8x1xf32, #tpu.memory_space<vmem>>, %arg8: memref<1x8x896xf32, #tpu.memory_space<vmem>>, %arg9: memref<216x896xbf16, #tpu.memory_space<vmem>>) attributes {dimension_semantics = [#tpu.dimension_semantics<parallel>], iteration_bounds = array<i64: 2>, scalar_prefetch = 0 : i64, scratch_operands = 1 : i64, tpu.core_type = #tpu.core_type<tc>, window_params = [{transform_indices = @transform_0, window_bounds = array<i64: 1, 8, 2808>}, {pipeline_mode = #tpu.pipeline_mode<synchronous>, transform_indices = @transform_1, window_bounds = array<i64: 24, 216>}, {pipeline_mode = #tpu.pipeline_mode<synchronous>, transform_indices = @transform_2, window_bounds = array<i64: 24, 1>}, {pipeline_mode = #tpu.pipeline_mode<synchronous>, transform_indices = @transform_3, window_bounds = array<i64: 24, 1>}, {pipeline_mode = #tpu.pipeline_mode<synchronous>, transform_indices = @transform_4, window_bounds = array<i64: 24, 1>}, {pipeline_mode = #tpu.pipeline_mode<synchronous>, transform_indices = @transform_5, window_bounds = array<i64: 8, 24>}, {pipeline_mode = #tpu.pipeline_mode<synchronous>, transform_indices = @transform_6, window_bounds = array<i64: 8, 1>}, {transform_indices = @transform_7, window_bounds = array<i64: 1, 8, 896>}]} {
    %c0 = arith.constant 0 : index
    %c0_0 = arith.constant 0 : index
    %c636 = arith.constant 636 : index
    %0 = vector.load %arg1[%c0, %c0_0, %c636] : memref<1x8x2808xbf16, #tpu.memory_space<vmem>>, vector<1x8x896xbf16>
    %1 = vector.shape_cast %0 : vector<1x8x896xbf16> to vector<8x896xbf16>
    %c0_1 = arith.constant 0 : index
    %c0_2 = arith.constant 0 : index
    %2 = vector.load %arg9[%c0_1, %c0_2] : memref<216x896xbf16, #tpu.memory_space<vmem>>, vector<8x896xbf16>
    tpu.vector_store %arg9[%c0_1, %c0_2], %1 {strides = array<i32>} : memref<216x896xbf16, #tpu.memory_space<vmem>>, vector<8x896xbf16>,
    %c0_3 = arith.constant 0 : index
    %c0_4 = arith.constant 0 : index
    %c642 = arith.constant 642 : index
    %3 = vector.load %arg1[%c0_3, %c0_4, %c642] : memref<1x8x2808xbf16, #tpu.memory_space<vmem>>, vector<1x8x896xbf16>
    %4 = vector.shape_cast %3 : vector<1x8x896xbf16> to vector<8x896xbf16>
    %c8 = arith.constant 8 : index
    %c0_5 = arith.constant 0 : index
    %5 = vector.load %arg9[%c8, %c0_5] : memref<216x896xbf16, #tpu.memory_space<vmem>>, vector<8x896xbf16>
    tpu.vector_store %arg9[%c8, %c0_5], %4 {strides = array<i32>} : memref<216x896xbf16, #tpu.memory_space<vmem>>, vector<8x896xbf16>,
    %c0_6 = arith.constant 0 : index
    %c0_7 = arith.constant 0 : index
    %c648 = arith.constant 648 : index
    %6 = vector.load %arg1[%c0_6, %c0_7, %c648] : memref<1x8x2808xbf16, #tpu.memory_space<vmem>>, vector<1x8x896xbf16>
    %7 = vector.shape_cast %6 : vector<1x8x896xbf16> to vector<8x896xbf16>
    %c16 = arith.constant 16 : index
    %c0_8 = arith.constant 0 : index
    %8 = vector.load %arg9[%c16, %c0_8] : memref<216x896xbf16, #tpu.memory_space<vmem>>, vector<8x896xbf16>
    tpu.vector_store %arg9[%c16, %c0_8], %7 {strides = array<i32>} : memref<216x896xbf16, #tpu.memory_space<vmem>>, vector<8x896xbf16>,
    %c0_9 = arith.constant 0 : index
    %c0_10 = arith.constant 0 : index
    %c948 = arith.constant 948 : index
    %9 = vector.load %arg1[%c0_9, %c0_10, %c948] : memref<1x8x2808xbf16, #tpu.memory_space<vmem>>, vector<1x8x896xbf16>
    %10 = vector.shape_cast %9 : vector<1x8x896xbf16> to vector<8x896xbf16>
    %c24 = arith.constant 24 : index
    %c0_11 = arith.constant 0 : index
    %11 = vector.load %arg9[%c24, %c0_11] : memref<216x896xbf16, #tpu.memory_space<vmem>>, vector<8x896xbf16>
    tpu.vector_store %arg9[%c24, %c0_11], %10 {strides = array<i32>} : memref<216x896xbf16, #tpu.memory_space<vmem>>, vector<8x896xbf16>,
    %c0_12 = arith.constant 0 : index
    %c0_13 = arith.constant 0 : index
    %c954 = arith.constant 954 : index
    %12 = vector.load %arg1[%c0_12, %c0_13, %c954] : memref<1x8x2808xbf16, #tpu.memory_space<vmem>>, vector<1x8x896xbf16>
    %13 = vector.shape_cast %12 : vector<1x8x896xbf16> to vector<8x896xbf16>
    %c32 = arith.constant 32 : index
    %c0_14 = arith.constant 0 : index
    %14 = vector.load %arg9[%c32, %c0_14] : memref<216x896xbf16, #tpu.memory_space<vmem>>, vector<8x896xbf16>
    tpu.vector_store %arg9[%c32, %c0_14], %13 {strides = array<i32>} : memref<216x896xbf16, #tpu.memory_space<vmem>>, vector<8x896xbf16>,
    %c0_15 = arith.constant 0 : index
    %c0_16 = arith.constant 0 : index
    %c960 = arith.constant 960 : index
    %15 = vector.load %arg1[%c0_15, %c0_16, %c960] : memref<1x8x2808xbf16, #tpu.memory_space<vmem>>, vector<1x8x896xbf16>
    %16 = vector.shape_cast %15 : vector<1x8x896xbf16> to vector<8x896xbf16>
    %c40 = arith.constant 40 : index
    %c0_17 = arith.constant 0 : index
    %17 = vector.load %arg9[%c40, %c0_17] : memref<216x896xbf16, #tpu.memory_space<vmem>>, vector<8x896xbf16>
    tpu.vector_store %arg9[%c40, %c0_17], %16 {strides = array<i32>} : memref<216x896xbf16, #tpu.memory_space<vmem>>, vector<8x896xbf16>,
    %c0_18 = arith.constant 0 : index
    %c0_19 = arith.constant 0 : index
    %c1260 = arith.constant 1260 : index
    %18 = vector.load %arg1[%c0_18, %c0_19, %c1260] : memref<1x8x2808xbf16, #tpu.memory_space<vmem>>, vector<1x8x896xbf16>
    %19 = vector.shape_cast %18 : vector<1x8x896xbf16> to vector<8x896xbf16>
    %c48 = arith.constant 48 : index
    %c0_20 = arith.constant 0 : index
    %20 = vector.load %arg9[%c48, %c0_20] : memref<216x896xbf16, #tpu.memory_space<vmem>>, vector<8x896xbf16>
    tpu.vector_store %arg9[%c48, %c0_20], %19 {strides = array<i32>} : memref<216x896xbf16, #tpu.memory_space<vmem>>, vector<8x896xbf16>,
    %c0_21 = arith.constant 0 : index
    %c0_22 = arith.constant 0 : index
    %c1266 = arith.constant 1266 : index
    %21 = vector.load %arg1[%c0_21, %c0_22, %c1266] : memref<1x8x2808xbf16, #tpu.memory_space<vmem>>, vector<1x8x896xbf16>
    %22 = vector.shape_cast %21 : vector<1x8x896xbf16> to vector<8x896xbf16>
    %c56 = arith.constant 56 : index
    %c0_23 = arith.constant 0 : index
    %23 = vector.load %arg9[%c56, %c0_23] : memref<216x896xbf16, #tpu.memory_space<vmem>>, vector<8x896xbf16>
    tpu.vector_store %arg9[%c56, %c0_23], %22 {strides = array<i32>} : memref<216x896xbf16, #tpu.memory_space<vmem>>, vector<8x896xbf16>,
    %c0_24 = arith.constant 0 : index
    %c0_25 = arith.constant 0 : index
    %c1272 = arith.constant 1272 : index
    %24 = vector.load %arg1[%c0_24, %c0_25, %c1272] : memref<1x8x2808xbf16, #tpu.memory_space<vmem>>, vector<1x8x896xbf16>
    %25 = vector.shape_cast %24 : vector<1x8x896xbf16> to vector<8x896xbf16>
    %c64 = arith.constant 64 : index
    %c0_26 = arith.constant 0 : index
    %26 = vector.load %arg9[%c64, %c0_26] : memref<216x896xbf16, #tpu.memory_space<vmem>>, vector<8x896xbf16>
    tpu.vector_store %arg9[%c64, %c0_26], %25 {strides = array<i32>} : memref<216x896xbf16, #tpu.memory_space<vmem>>, vector<8x896xbf16>,
    %c0_27 = arith.constant 0 : index
    %c0_28 = arith.constant 0 : index
    %c318 = arith.constant 318 : index
    %27 = vector.load %arg1[%c0_27, %c0_28, %c318] : memref<1x8x2808xbf16, #tpu.memory_space<vmem>>, vector<1x8x896xbf16>
    %28 = vector.shape_cast %27 : vector<1x8x896xbf16> to vector<8x896xbf16>
    %c72 = arith.constant 72 : index
    %c0_29 = arith.constant 0 : index
    %29 = vector.load %arg9[%c72, %c0_29] : memref<216x896xbf16, #tpu.memory_space<vmem>>, vector<8x896xbf16>
    tpu.vector_store %arg9[%c72, %c0_29], %28 {strides = array<i32>} : memref<216x896xbf16, #tpu.memory_space<vmem>>, vector<8x896xbf16>,
    %c0_30 = arith.constant 0 : index
    %c0_31 = arith.constant 0 : index
    %c330 = arith.constant 330 : index
    %30 = vector.load %arg1[%c0_30, %c0_31, %c330] : memref<1x8x2808xbf16, #tpu.memory_space<vmem>>, vector<1x8x896xbf16>
    %31 = vector.shape_cast %30 : vector<1x8x896xbf16> to vector<8x896xbf16>
    %c80 = arith.constant 80 : index
    %c0_32 = arith.constant 0 : index
    %32 = vector.load %arg9[%c80, %c0_32] : memref<216x896xbf16, #tpu.memory_space<vmem>>, vector<8x896xbf16>
    tpu.vector_store %arg9[%c80, %c0_32], %31 {strides = array<i32>} : memref<216x896xbf16, #tpu.memory_space<vmem>>, vector<8x896xbf16>,
    %c0_33 = arith.constant 0 : index
    %c0_34 = arith.constant 0 : index
    %c342 = arith.constant 342 : index
    %33 = vector.load %arg1[%c0_33, %c0_34, %c342] : memref<1x8x2808xbf16, #tpu.memory_space<vmem>>, vector<1x8x896xbf16>
    %34 = vector.shape_cast %33 : vector<1x8x896xbf16> to vector<8x896xbf16>
    %c88 = arith.constant 88 : index
    %c0_35 = arith.constant 0 : index
    %35 = vector.load %arg9[%c88, %c0_35] : memref<216x896xbf16, #tpu.memory_space<vmem>>, vector<8x896xbf16>
    tpu.vector_store %arg9[%c88, %c0_35], %34 {strides = array<i32>} : memref<216x896xbf16, #tpu.memory_space<vmem>>, vector<8x896xbf16>,
    %c0_36 = arith.constant 0 : index
    %c0_37 = arith.constant 0 : index
    %c942 = arith.constant 942 : index
    %36 = vector.load %arg1[%c0_36, %c0_37, %c942] : memref<1x8x2808xbf16, #tpu.memory_space<vmem>>, vector<1x8x896xbf16>
    %37 = vector.shape_cast %36 : vector<1x8x896xbf16> to vector<8x896xbf16>
    %c96 = arith.constant 96 : index
    %c0_38 = arith.constant 0 : index
    %38 = vector.load %arg9[%c96, %c0_38] : memref<216x896xbf16, #tpu.memory_space<vmem>>, vector<8x896xbf16>
    tpu.vector_store %arg9[%c96, %c0_38], %37 {strides = array<i32>} : memref<216x896xbf16, #tpu.memory_space<vmem>>, vector<8x896xbf16>,
    %c0_39 = arith.constant 0 : index
    %c0_40 = arith.constant 0 : index
    %c954_41 = arith.constant 954 : index
    %39 = vector.load %arg1[%c0_39, %c0_40, %c954_41] : memref<1x8x2808xbf16, #tpu.memory_space<vmem>>, vector<1x8x896xbf16>
    %40 = vector.shape_cast %39 : vector<1x8x896xbf16> to vector<8x896xbf16>
    %c104 = arith.constant 104 : index
    %c0_42 = arith.constant 0 : index
    %41 = vector.load %arg9[%c104, %c0_42] : memref<216x896xbf16, #tpu.memory_space<vmem>>, vector<8x896xbf16>
    tpu.vector_store %arg9[%c104, %c0_42], %40 {strides = array<i32>} : memref<216x896xbf16, #tpu.memory_space<vmem>>, vector<8x896xbf16>,
    %c0_43 = arith.constant 0 : index
    %c0_44 = arith.constant 0 : index
    %c966 = arith.constant 966 : index
    %42 = vector.load %arg1[%c0_43, %c0_44, %c966] : memref<1x8x2808xbf16, #tpu.memory_space<vmem>>, vector<1x8x896xbf16>
    %43 = vector.shape_cast %42 : vector<1x8x896xbf16> to vector<8x896xbf16>
    %c112 = arith.constant 112 : index
    %c0_45 = arith.constant 0 : index
    %44 = vector.load %arg9[%c112, %c0_45] : memref<216x896xbf16, #tpu.memory_space<vmem>>, vector<8x896xbf16>
    tpu.vector_store %arg9[%c112, %c0_45], %43 {strides = array<i32>} : memref<216x896xbf16, #tpu.memory_space<vmem>>, vector<8x896xbf16>,
    %c0_46 = arith.constant 0 : index
    %c0_47 = arith.constant 0 : index
    %c1566 = arith.constant 1566 : index
    %45 = vector.load %arg1[%c0_46, %c0_47, %c1566] : memref<1x8x2808xbf16, #tpu.memory_space<vmem>>, vector<1x8x896xbf16>
    %46 = vector.shape_cast %45 : vector<1x8x896xbf16> to vector<8x896xbf16>
    %c120 = arith.constant 120 : index
    %c0_48 = arith.constant 0 : index
    %47 = vector.load %arg9[%c120, %c0_48] : memref<216x896xbf16, #tpu.memory_space<vmem>>, vector<8x896xbf16>
    tpu.vector_store %arg9[%c120, %c0_48], %46 {strides = array<i32>} : memref<216x896xbf16, #tpu.memory_space<vmem>>, vector<8x896xbf16>,
    %c0_49 = arith.constant 0 : index
    %c0_50 = arith.constant 0 : index
    %c1578 = arith.constant 1578 : index
    %48 = vector.load %arg1[%c0_49, %c0_50, %c1578] : memref<1x8x2808xbf16, #tpu.memory_space<vmem>>, vector<1x8x896xbf16>
    %49 = vector.shape_cast %48 : vector<1x8x896xbf16> to vector<8x896xbf16>
    %c128 = arith.constant 128 : index
    %c0_51 = arith.constant 0 : index
    %50 = vector.load %arg9[%c128, %c0_51] : memref<216x896xbf16, #tpu.memory_space<vmem>>, vector<8x896xbf16>
    tpu.vector_store %arg9[%c128, %c0_51], %49 {strides = array<i32>} : memref<216x896xbf16, #tpu.memory_space<vmem>>, vector<8x896xbf16>,
    %c0_52 = arith.constant 0 : index
    %c0_53 = arith.constant 0 : index
    %c1590 = arith.constant 1590 : index
    %51 = vector.load %arg1[%c0_52, %c0_53, %c1590] : memref<1x8x2808xbf16, #tpu.memory_space<vmem>>, vector<1x8x896xbf16>
    %52 = vector.shape_cast %51 : vector<1x8x896xbf16> to vector<8x896xbf16>
    %c136 = arith.constant 136 : index
    %c0_54 = arith.constant 0 : index
    %53 = vector.load %arg9[%c136, %c0_54] : memref<216x896xbf16, #tpu.memory_space<vmem>>, vector<8x896xbf16>
    tpu.vector_store %arg9[%c136, %c0_54], %52 {strides = array<i32>} : memref<216x896xbf16, #tpu.memory_space<vmem>>, vector<8x896xbf16>,
    %c0_55 = arith.constant 0 : index
    %c0_56 = arith.constant 0 : index
    %c0_57 = arith.constant 0 : index
    %54 = vector.load %arg1[%c0_55, %c0_56, %c0_57] : memref<1x8x2808xbf16, #tpu.memory_space<vmem>>, vector<1x8x896xbf16>
    %55 = vector.shape_cast %54 : vector<1x8x896xbf16> to vector<8x896xbf16>
    %c144 = arith.constant 144 : index
    %c0_58 = arith.constant 0 : index
    %56 = vector.load %arg9[%c144, %c0_58] : memref<216x896xbf16, #tpu.memory_space<vmem>>, vector<8x896xbf16>
    tpu.vector_store %arg9[%c144, %c0_58], %55 {strides = array<i32>} : memref<216x896xbf16, #tpu.memory_space<vmem>>, vector<8x896xbf16>,
    %c0_59 = arith.constant 0 : index
    %c0_60 = arith.constant 0 : index
    %c18 = arith.constant 18 : index
    %57 = vector.load %arg1[%c0_59, %c0_60, %c18] : memref<1x8x2808xbf16, #tpu.memory_space<vmem>>, vector<1x8x896xbf16>
    %58 = vector.shape_cast %57 : vector<1x8x896xbf16> to vector<8x896xbf16>
    %c152 = arith.constant 152 : index
    %c0_61 = arith.constant 0 : index
    %59 = vector.load %arg9[%c152, %c0_61] : memref<216x896xbf16, #tpu.memory_space<vmem>>, vector<8x896xbf16>
    tpu.vector_store %arg9[%c152, %c0_61], %58 {strides = array<i32>} : memref<216x896xbf16, #tpu.memory_space<vmem>>, vector<8x896xbf16>,
    %c0_62 = arith.constant 0 : index
    %c0_63 = arith.constant 0 : index
    %c36 = arith.constant 36 : index
    %60 = vector.load %arg1[%c0_62, %c0_63, %c36] : memref<1x8x2808xbf16, #tpu.memory_space<vmem>>, vector<1x8x896xbf16>
    %61 = vector.shape_cast %60 : vector<1x8x896xbf16> to vector<8x896xbf16>
    %c160 = arith.constant 160 : index
    %c0_64 = arith.constant 0 : index
    %62 = vector.load %arg9[%c160, %c0_64] : memref<216x896xbf16, #tpu.memory_space<vmem>>, vector<8x896xbf16>
    tpu.vector_store %arg9[%c160, %c0_64], %61 {strides = array<i32>} : memref<216x896xbf16, #tpu.memory_space<vmem>>, vector<8x896xbf16>,
    %c0_65 = arith.constant 0 : index
    %c0_66 = arith.constant 0 : index
    %c936 = arith.constant 936 : index
    %63 = vector.load %arg1[%c0_65, %c0_66, %c936] : memref<1x8x2808xbf16, #tpu.memory_space<vmem>>, vector<1x8x896xbf16>
    %64 = vector.shape_cast %63 : vector<1x8x896xbf16> to vector<8x896xbf16>
    %c168 = arith.constant 168 : index
    %c0_67 = arith.constant 0 : index
    %65 = vector.load %arg9[%c168, %c0_67] : memref<216x896xbf16, #tpu.memory_space<vmem>>, vector<8x896xbf16>
    tpu.vector_store %arg9[%c168, %c0_67], %64 {strides = array<i32>} : memref<216x896xbf16, #tpu.memory_space<vmem>>, vector<8x896xbf16>,
    %c0_68 = arith.constant 0 : index
    %c0_69 = arith.constant 0 : index
    %c954_70 = arith.constant 954 : index
    %66 = vector.load %arg1[%c0_68, %c0_69, %c954_70] : memref<1x8x2808xbf16, #tpu.memory_space<vmem>>, vector<1x8x896xbf16>
    %67 = vector.shape_cast %66 : vector<1x8x896xbf16> to vector<8x896xbf16>
    %c176 = arith.constant 176 : index
    %c0_71 = arith.constant 0 : index
    %68 = vector.load %arg9[%c176, %c0_71] : memref<216x896xbf16, #tpu.memory_space<vmem>>, vector<8x896xbf16>
    tpu.vector_store %arg9[%c176, %c0_71], %67 {strides = array<i32>} : memref<216x896xbf16, #tpu.memory_space<vmem>>, vector<8x896xbf16>,
    %c0_72 = arith.constant 0 : index
    %c0_73 = arith.constant 0 : index
    %c972 = arith.constant 972 : index
    %69 = vector.load %arg1[%c0_72, %c0_73, %c972] : memref<1x8x2808xbf16, #tpu.memory_space<vmem>>, vector<1x8x896xbf16>
    %70 = vector.shape_cast %69 : vector<1x8x896xbf16> to vector<8x896xbf16>
    %c184 = arith.constant 184 : index
    %c0_74 = arith.constant 0 : index
    %71 = vector.load %arg9[%c184, %c0_74] : memref<216x896xbf16, #tpu.memory_space<vmem>>, vector<8x896xbf16>
    tpu.vector_store %arg9[%c184, %c0_74], %70 {strides = array<i32>} : memref<216x896xbf16, #tpu.memory_space<vmem>>, vector<8x896xbf16>,
    %c0_75 = arith.constant 0 : index
    %c0_76 = arith.constant 0 : index
    %c1872 = arith.constant 1872 : index
    %72 = vector.load %arg1[%c0_75, %c0_76, %c1872] : memref<1x8x2808xbf16, #tpu.memory_space<vmem>>, vector<1x8x896xbf16>
    %73 = vector.shape_cast %72 : vector<1x8x896xbf16> to vector<8x896xbf16>
    %c192 = arith.constant 192 : index
    %c0_77 = arith.constant 0 : index
    %74 = vector.load %arg9[%c192, %c0_77] : memref<216x896xbf16, #tpu.memory_space<vmem>>, vector<8x896xbf16>
    tpu.vector_store %arg9[%c192, %c0_77], %73 {strides = array<i32>} : memref<216x896xbf16, #tpu.memory_space<vmem>>, vector<8x896xbf16>,
    %c0_78 = arith.constant 0 : index
    %c0_79 = arith.constant 0 : index
    %c1890 = arith.constant 1890 : index
    %75 = vector.load %arg1[%c0_78, %c0_79, %c1890] : memref<1x8x2808xbf16, #tpu.memory_space<vmem>>, vector<1x8x896xbf16>
    %76 = vector.shape_cast %75 : vector<1x8x896xbf16> to vector<8x896xbf16>
    %c200 = arith.constant 200 : index
    %c0_80 = arith.constant 0 : index
    %77 = vector.load %arg9[%c200, %c0_80] : memref<216x896xbf16, #tpu.memory_space<vmem>>, vector<8x896xbf16>
    tpu.vector_store %arg9[%c200, %c0_80], %76 {strides = array<i32>} : memref<216x896xbf16, #tpu.memory_space<vmem>>, vector<8x896xbf16>,
    %c0_81 = arith.constant 0 : index
    %c0_82 = arith.constant 0 : index
    %c1908 = arith.constant 1908 : index
    %78 = vector.load %arg1[%c0_81, %c0_82, %c1908] : memref<1x8x2808xbf16, #tpu.memory_space<vmem>>, vector<1x8x896xbf16>
    %79 = vector.shape_cast %78 : vector<1x8x896xbf16> to vector<8x896xbf16>
    %c208 = arith.constant 208 : index
    %c0_83 = arith.constant 0 : index
    %80 = vector.load %arg9[%c208, %c0_83] : memref<216x896xbf16, #tpu.memory_space<vmem>>, vector<8x896xbf16>
    tpu.vector_store %arg9[%c208, %c0_83], %79 {strides = array<i32>} : memref<216x896xbf16, #tpu.memory_space<vmem>>, vector<8x896xbf16>,
    %c0_84 = arith.constant 0 : index
    %c0_85 = arith.constant 0 : index
    %81 = vector.load %arg2[%c0_84, %c0_85] : memref<24x216xbf16, #tpu.memory_space<vmem>>, vector<24x216xbf16>
    %c0_86 = arith.constant 0 : index
    %c0_87 = arith.constant 0 : index
    %82 = vector.load %arg9[%c0_86, %c0_87] : memref<216x896xbf16, #tpu.memory_space<vmem>>, vector<216x896xbf16>
    %cst = arith.constant dense<0.000000e+00> : vector<24x896xf32>
    %83 = tpu.matmul %81, %82, %cst {dimension_numbers = #tpu.dot_dimension_numbers<[1], [0], [0], [1], [0, 0, 1, 1], [], []>} : vector<24x216xbf16>, vector<216x896xbf16>, vector<24x896xf32> -> vector<24x896xf32>
    %c0_88 = arith.constant 0 : index
    %c0_89 = arith.constant 0 : index
    %84 = vector.load %arg3[%c0_88, %c0_89] : memref<24x1xf32, #tpu.memory_space<vmem>>, vector<24x1xf32>
    %85 = vector.broadcast %84 : vector<24x1xf32> to vector<24x896xf32>
    %86 = arith.addf %83, %85 : vector<24x896xf32>
    %cst_90 = arith.constant 0.000000e+00 : f32
    %87 = vector.broadcast %cst_90 : f32 to vector<24x896xf32>
    %88 = arith.maximumf %86, %87 : vector<24x896xf32>
    %c0_91 = arith.constant 0 : index
    %c0_92 = arith.constant 0 : index
    %89 = vector.load %arg4[%c0_91, %c0_92] : memref<24x1xf32, #tpu.memory_space<vmem>>, vector<24x1xf32>
    %90 = vector.broadcast %89 : vector<24x1xf32> to vector<24x896xf32>
    %91 = arith.mulf %88, %90 : vector<24x896xf32>
    %c0_93 = arith.constant 0 : index
    %c0_94 = arith.constant 0 : index
    %92 = vector.load %arg5[%c0_93, %c0_94] : memref<24x1xf32, #tpu.memory_space<vmem>>, vector<24x1xf32>
    %93 = vector.broadcast %92 : vector<24x1xf32> to vector<24x896xf32>
    %94 = arith.addf %91, %93 : vector<24x896xf32>
    %c0_95 = arith.constant 0 : index
    %c0_96 = arith.constant 0 : index
    %95 = vector.load %arg6[%c0_95, %c0_96] : memref<8x24xbf16, #tpu.memory_space<vmem>>, vector<8x24xbf16>
    %96 = arith.truncf %94 : vector<24x896xf32> to vector<24x896xbf16>
    %cst_97 = arith.constant dense<0.000000e+00> : vector<8x896xf32>
    %97 = tpu.matmul %95, %96, %cst_97 {dimension_numbers = #tpu.dot_dimension_numbers<[1], [0], [0], [1], [0, 0, 1, 1], [], []>} : vector<8x24xbf16>, vector<24x896xbf16>, vector<8x896xf32> -> vector<8x896xf32>
    %c0_98 = arith.constant 0 : index
    %c0_99 = arith.constant 0 : index
    %98 = vector.load %arg7[%c0_98, %c0_99] : memref<8x1xf32, #tpu.memory_space<vmem>>, vector<8x1xf32>
    %99 = vector.broadcast %98 : vector<8x1xf32> to vector<8x896xf32>
    %100 = arith.addf %97, %99 : vector<8x896xf32>
    %c0_100 = arith.constant 0 : index
    %c0_101 = arith.constant 0 : index
    %c0_102 = arith.constant 0 : index
    %101 = vector.load %arg8[%c0_100, %c0_101, %c0_102] : memref<1x8x896xf32, #tpu.memory_space<vmem>>, vector<1x8x896xf32>
    %102 = vector.shape_cast %101 : vector<1x8x896xf32> to vector<8x896xf32>
    %103 = vector.shape_cast %100 : vector<8x896xf32> to vector<1x8x896xf32>
    tpu.vector_store %arg8[%c0_100, %c0_101, %c0_102], %103 {strides = array<i32>} : memref<1x8x896xf32, #tpu.memory_space<vmem>>, vector<1x8x896xf32>,
    return
  }
  func.func @transform_0(%arg0: i32) -> (i32, i32, i32) {
    %c0_i32 = arith.constant 0 : i32
    %c0_i32_0 = arith.constant 0 : i32
    %c0_i32_1 = arith.constant 0 : i32
    return %arg0, %c0_i32, %c0_i32_0 : i32, i32, i32
  }
  func.func @transform_1(%arg0: i32) -> (i32, i32) {
    %c0_i32 = arith.constant 0 : i32
    %c0_i32_0 = arith.constant 0 : i32
    %c0_i32_1 = arith.constant 0 : i32
    return %c0_i32, %c0_i32_0 : i32, i32
  }
  func.func @transform_2(%arg0: i32) -> (i32, i32) {
    %c0_i32 = arith.constant 0 : i32
    %c0_i32_0 = arith.constant 0 : i32
    %c0_i32_1 = arith.constant 0 : i32
    return %c0_i32, %c0_i32_0 : i32, i32
  }
  func.func @transform_3(%arg0: i32) -> (i32, i32) {
    %c0_i32 = arith.constant 0 : i32
    %c0_i32_0 = arith.constant 0 : i32
    %c0_i32_1 = arith.constant 0 : i32
    return %c0_i32, %c0_i32_0 : i32, i32
  }
  func.func @transform_4(%arg0: i32) -> (i32, i32) {
    %c0_i32 = arith.constant 0 : i32
    %c0_i32_0 = arith.constant 0 : i32
    %c0_i32_1 = arith.constant 0 : i32
    return %c0_i32, %c0_i32_0 : i32, i32
  }
  func.func @transform_5(%arg0: i32) -> (i32, i32) {
    %c0_i32 = arith.constant 0 : i32
    %c0_i32_0 = arith.constant 0 : i32
    %c0_i32_1 = arith.constant 0 : i32
    return %c0_i32, %c0_i32_0 : i32, i32
  }
  func.func @transform_6(%arg0: i32) -> (i32, i32) {
    %c0_i32 = arith.constant 0 : i32
    %c0_i32_0 = arith.constant 0 : i32
    %c0_i32_1 = arith.constant 0 : i32
    return %c0_i32, %c0_i32_0 : i32, i32
  }
  func.func @transform_7(%arg0: i32) -> (i32, i32, i32) {
    %c0_i32 = arith.constant 0 : i32
    %c0_i32_0 = arith.constant 0 : i32
    %c0_i32_1 = arith.constant 0 : i32
    return %arg0, %c0_i32, %c0_i32_0 : i32, i32, i32
  }
}

</mosaic_0001>

<bundles_post_ra>
// kernel: tpu_custom_call.1
= control target key start
LH: loop header
LB: loop body
LE: loop exit
PB: predicated region body
PF: predicated region fallthrough
CT: control target
= control target key end

     0   :  { %s4426_s0 = inlined_call_operand.hbm [shape: bf16[2,8,2808], index: 0, kind: input, shape index: {}]   ;;  %s4427_s1 = inlined_call_operand.hbm [shape: bf16[24,216], index: 1, kind: input, shape index: {}]   ;;  %s4428_s2 = inlined_call_operand.hbm [shape: f32[24,1], index: 2, kind: input, shape index: {}]   ;;  %s4429_s3 = inlined_call_operand.hbm [shape: f32[24,1], index: 3, kind: input, shape index: {}]   ;;  %s4430_s4 = inlined_call_operand.hbm [shape: f32[24,1], index: 4, kind: input, shape index: {}]   ;;  %s4431_s5 = inlined_call_operand.hbm [shape: bf16[8,24], index: 5, kind: input, shape index: {}]   ;;  %s4432_s6 = inlined_call_operand.hbm [shape: f32[8,1], index: 6, kind: input, shape index: {}]   ;;  %s4433_s7 = inlined_call_operand.hbm [shape: f32[2,8,896], index: 7, kind: output, shape index: {}]  }
   0x1   :  { %4465 = sst [smem:[#allocation21_spill]] %s4427_s1 }
   0x2   :  { %12 = vsyncpa [#allocation4], 0 }
   0x3   :  { %14 = vsyncpa [#allocation4 + $0x1], 0 }
   0x4   :  { %15 = vsyncpa [#allocation7], 0 }
   0x5   :  { %16 = vsyncpa [#allocation10], 0 }
   0x6   :  { %17 = vsyncpa [#allocation13], 0 }
   0x7   :  { %18 = vsyncpa [#allocation5], 0 }
   0x8   :  { %20 = vsyncpa [#allocation5 + $0x1], 0  ;;  %s3309_s24 = smov 0   ;;  %s3311_s25 = smov 0  }
   0x9   :  { %s3313_s26 = smov 0   ;;  %s3315_s27 = smov 0  }
   0xa LB: > { %s3232_s28 = smov [#allocation6]   ;;  %s3330_s30 = sadd.s32 4294967295, %s3230_s27   ;;  %s3230_s27 = sphi %s3315_s27, %s4525_s27   ;;  %s3226_s26 = sphi %s3313_s26, %s4524_s26   ;;  %s3222_s25 = sphi %s3311_s25, %s4523_s25   ;;  %s3218_s24 = sphi %s3309_s24, %s4522_s24  }
   0xb   : > { %s221_s29 = sshll.u32 %s3232_s28, 4  ;;  %p2640_p0 = scmp.ge.s32.totalorder %s3230_s27, 1  ;;  %s3335_s29 = int_to_ptr.vmem [resolvable:$true] %s221_s29 }
   0xc   : > { %p4434_p1 = scmp.eq.s32.totalorder %s3330_s30, 0  ;;  %p209_p2 = scmp.lt.s32.totalorder %s3230_s27, 3 }
   0xd   : > { %s3233_s9 = smov [#allocation9]   ;;  %s3234_s12 = smov [#allocation12]  }
   0xe   : > { %p3337_p3 = pnand %p2640_p0, %p209_p2  ;;  %s247_s10 = sshll.u32 %s3233_s9, 4  ;;  %s3350_s10 = int_to_ptr.vmem [resolvable:$true] %s247_s10 }
   0xf   : > { %s274_s13 = sshll.u32 %s3234_s12, 4  ;;  %s4468_s1 = sld [smem:[#allocation21_spill]]  ;;  %s3352_s13 = int_to_ptr.vmem [resolvable:$true] %s274_s13 }
  0x10   : > { %s4466_s8 = scalar_select %p3337_p3, 1, 0 }
  0x11   : > { %p2823_p5 = pneg %p3337_p3 }
  0x13   : > { %p3346_p6 = pnand %p2823_p5, %p4434_p1 }
  0x15   : > { %s2954_s16 = scalar_lea.hbm %s4468_s1, 384  ;;  %p3362_p8 = pneg %p3346_p6 }
  0x16   : > { %p2955_p7 = scmp.ne.s32.totalorder %s4468_s1, %s2954_s16  ;;  %p2961_p11 = scmp.lt.u32.totalorder %s2954_s16, %s4468_s1 }
  0x18   : > { %p2957_p9 = pnand %p3362_p8, %p2955_p7 }
  0x1a   : > { %p2958_p10 = pneg %p2957_p9 }
  0x1c   : > { %p2963_p12 = pnand %p2961_p11, %p2958_p10 }
  0x1e   : > { %2966 = shalt.err (!%p2963_p12)
}
  0x1f   : > { %s2967_s22 = scalar_lea.vmem %s3335_s29, 384  ;;  %p2975_p5 = scmp.lt.s32.totalorder %s3335_s29, %s3335_s29 }
  0x20   : > { %p2968_p13 = scmp.ne.s32.totalorder %s3335_s29, %s2967_s22  ;;  %p2976_p4 = scmp.lt.s32.totalorder %s2967_s22, %s2967_s22 }
  0x22   : > { %p2970_p0 = pnand %p2968_p13, %p3362_p8  ;;  %p2977_p7 = por %p2976_p4, %p2975_p5 }
  0x24   : > { %p2971_p2 = pneg %p2970_p0 }
  0x26   : > { %p2978_p9 = pnand %p2977_p7, %p2971_p2 }
  0x28   : > { %2981 = shalt.err (!%p2978_p9)
}
  0x29   : > { %s3235_s23 = smov 128   ;;  %s3236_s28 = smov 8  }
  0x2a   : > { %2826 = dma.hbm_to_vmem [thread:$0]  (!%p3346_p6), %s4468_s1, 384, %s3335_s29, [#allocation7], %s3235_s23, %s3235_s23, %s3236_s28  }
  0x2b   : > { %s2982_s16 = scalar_lea.hbm %s4429_s3, 384 }
  0x2c   : > { %p2983_p4 = scmp.ne.s32.totalorder %s4429_s3, %s2982_s16  ;;  %p2989_p12 = scmp.lt.u32.totalorder %s2982_s16, %s4429_s3 }
  0x2e   : > { %p2985_p10 = pnand %p2983_p4, %p3362_p8 }
  0x30   : > { %p2986_p11 = pneg %p2985_p10 }
  0x32   : > { %p2991_p13 = pnand %p2989_p12, %p2986_p11 }
  0x34   : > { %2994 = shalt.err (!%p2991_p13)
}
  0x35   : > { %s2995_s29 = scalar_lea.vmem %s3350_s10, 384  ;;  %p3003_p7 = scmp.lt.s32.totalorder %s3350_s10, %s3350_s10 }
  0x36   : > { %p2996_p0 = scmp.ne.s32.totalorder %s3350_s10, %s2995_s29  ;;  %p3004_p9 = scmp.lt.s32.totalorder %s2995_s29, %s2995_s29 }
  0x38   : > { %p2998_p2 = pnand %p2996_p0, %p3362_p8  ;;  %p3005_p4 = por %p3004_p9, %p3003_p7 }
  0x3a   : > { %p2999_p5 = pneg %p2998_p2 }
  0x3c   : > { %p3006_p10 = pnand %p3005_p4, %p2999_p5 }
  0x3e   : > { %3009 = shalt.err (!%p3006_p10)
}
  0x3f   : > { %2832 = dma.hbm_to_vmem [thread:$0]  (!%p3346_p6), %s4429_s3, 384, %s3350_s10, [#allocation10], %s3235_s23, %s3235_s23, %s3236_s28  }
  0x40   : > { %s3010_s15 = scalar_lea.hbm %s4431_s5, 64 }
  0x41   : > { %p3011_p11 = scmp.ne.s32.totalorder %s4431_s5, %s3010_s15  ;;  %p3017_p0 = scmp.lt.u32.totalorder %s3010_s15, %s4431_s5 }
  0x43   : > { %p3013_p12 = pnand %p3011_p11, %p3362_p8 }
  0x45   : > { %p3014_p13 = pneg %p3013_p12 }
  0x47   : > { %p3019_p2 = pnand %p3017_p0, %p3014_p13 }
  0x49   : > { %3022 = shalt.err (!%p3019_p2)
}
  0x4a   : > { %s3023_s10 = scalar_lea.vmem %s3352_s13, 64  ;;  %p3031_p4 = scmp.lt.s32.totalorder %s3352_s13, %s3352_s13 }
  0x4b   : > { %p3024_p5 = scmp.ne.s32.totalorder %s3352_s13, %s3023_s10  ;;  %p3032_p10 = scmp.lt.s32.totalorder %s3023_s10, %s3023_s10 }
  0x4d   : > { %p3026_p7 = pnand %p3024_p5, %p3362_p8  ;;  %p3033_p11 = por %p3032_p10, %p3031_p4 }
  0x4f   : > { %p3027_p9 = pneg %p3026_p7 }
  0x51   : > { %p3034_p12 = pnand %p3033_p11, %p3027_p9 }
  0x53   : > { %3037 = shalt.err (!%p3034_p12)
}
  0x54   : > { %2838 = dma.hbm_to_vmem [thread:$0]  (!%p3346_p6), %s4431_s5, 64, %s3352_s13, [#allocation13]  }
  0x55   : > { %s3237_s22 = smov [#allocation8]   ;;  %s3238_s12 = smov [#allocation11]  }
  0x56   : > { %s234_s9 = sshll.u32 %s3237_s22, 4  ;;  %s260_s14 = sshll.u32 %s3238_s12, 4  ;;  %s235_s9 = int_to_ptr.vmem [resolvable:$true] %s234_s9  ;;  %s261_s14 = int_to_ptr.vmem [resolvable:$true] %s260_s14 }
  0x57   : > { %s3038_s17 = scalar_lea.hbm %s4428_s2, 384 }
  0x58   : > { %p3039_p13 = scmp.ne.s32.totalorder %s4428_s2, %s3038_s17  ;;  %p3045_p5 = scmp.lt.u32.totalorder %s3038_s17, %s4428_s2 }
  0x5a   : > { %p3041_p0 = pnand %p3039_p13, %p3362_p8 }
  0x5c   : > { %p3042_p2 = pneg %p3041_p0 }
  0x5e   : > { %p3047_p7 = pnand %p3045_p5, %p3042_p2 }
  0x60   : > { %3050 = shalt.err (!%p3047_p7)
}
  0x61   : > { %s3051_s13 = scalar_lea.vmem %s235_s9, 384  ;;  %p3059_p11 = scmp.lt.s32.totalorder %s235_s9, %s235_s9 }
  0x62   : > { %p3052_p9 = scmp.ne.s32.totalorder %s235_s9, %s3051_s13  ;;  %p3060_p12 = scmp.lt.s32.totalorder %s3051_s13, %s3051_s13 }
  0x64   : > { %p3054_p4 = pnand %p3052_p9, %p3362_p8  ;;  %p3061_p1 = por %p3060_p12, %p3059_p11 }
  0x66   : > { %p3055_p10 = pneg %p3054_p4 }
  0x68   : > { %p3062_p3 = pnand %p3061_p1, %p3055_p10 }
  0x6a   : > { %3065 = shalt.err (!%p3062_p3)
}
  0x6b   : > { %2829 = dma.hbm_to_vmem [thread:$0]  (!%p3346_p6), %s4428_s2, 384, %s235_s9, [#allocation7], %s3235_s23, %s3235_s23, %s3236_s28  }
  0x6c   : > { %s3066_s16 = scalar_lea.hbm %s4430_s4, 384 }
  0x6d   : > { %p3067_p1 = scmp.ne.s32.totalorder %s4430_s4, %s3066_s16  ;;  %p3073_p0 = scmp.lt.u32.totalorder %s3066_s16, %s4430_s4 }
  0x6f   : > { %p3069_p3 = pnand %p3067_p1, %p3362_p8 }
  0x71   : > { %p3070_p13 = pneg %p3069_p3 }
  0x73   : > { %p3075_p2 = pnand %p3073_p0, %p3070_p13 }
  0x75   : > { %3078 = shalt.err (!%p3075_p2)
}
  0x76   : > { %s3079_s21 = scalar_lea.vmem %s261_s14, 384  ;;  %p3087_p4 = scmp.lt.s32.totalorder %s261_s14, %s261_s14 }
  0x77   : > { %p3080_p5 = scmp.ne.s32.totalorder %s261_s14, %s3079_s21  ;;  %p3088_p10 = scmp.lt.s32.totalorder %s3079_s21, %s3079_s21 }
  0x79   : > { %p3082_p7 = pnand %p3080_p5, %p3362_p8  ;;  %p3089_p11 = por %p3088_p10, %p3087_p4 }
  0x7b   : > { %p3083_p9 = pneg %p3082_p7 }
  0x7d   : > { %p3090_p12 = pnand %p3089_p11, %p3083_p9 }
  0x7f   : > { %3093 = shalt.err (!%p3090_p12)
}
  0x80   : > { %2835 = dma.hbm_to_vmem [thread:$0]  (!%p3346_p6), %s4430_s4, 384, %s261_s14, [#allocation10], %s3235_s23, %s3235_s23, %s3236_s28  }
  0x81   : > { %s3239_s29 = smov [#allocation14]   ;;  %s3094_s16 = scalar_lea.hbm %s4432_s6, 128 }
  0x82   : > { %s285_s22 = sshll.u32 %s3239_s29, 4  ;;  %p3095_p1 = scmp.ne.s32.totalorder %s4432_s6, %s3094_s16  ;;  %s286_s22 = int_to_ptr.vmem [resolvable:$true] %s285_s22 }
  0x83   : > { %p3101_p0 = scmp.lt.u32.totalorder %s3094_s16, %s4432_s6 }
  0x84   : > { %p3097_p3 = pnand %p3095_p1, %p3362_p8 }
  0x86   : > { %p3098_p13 = pneg %p3097_p3 }
  0x88   : > { %p3103_p2 = pnand %p3101_p0, %p3098_p13 }
  0x8a   : > { %3106 = shalt.err (!%p3103_p2)
}
  0x8b   : > { %s3107_s23 = scalar_lea.vmem %s286_s22, 128  ;;  %p3115_p4 = scmp.lt.s32.totalorder %s286_s22, %s286_s22 }
  0x8c   : > { %p3108_p5 = scmp.ne.s32.totalorder %s286_s22, %s3107_s23  ;;  %p3116_p10 = scmp.lt.s32.totalorder %s3107_s23, %s3107_s23 }
  0x8e   : > { %p3110_p7 = pnand %p3108_p5, %p3362_p8  ;;  %p3117_p11 = por %p3116_p10, %p3115_p4 }
  0x90   : > { %p3111_p9 = pneg %p3110_p7 }
  0x92   : > { %p3118_p12 = pnand %p3117_p11, %p3111_p9 }
  0x94   : > { %3121 = shalt.err (!%p3118_p12)
}
  0x95   : > { %2841 = dma.hbm_to_vmem [thread:$0]  (!%p3346_p6), %s4432_s6, 128, %s286_s22, [#allocation13]  }
  0x96   : > { %s2639_s19 = sadd.s32 4294967294, %s3230_s27   ;;  %s3497_s11 = sadd.s32 1, %s3230_s27  }
  0x97   : > { %s30_s21 = ssub.s32 %s3230_s27, %s3497_s11  ;;  %s33_s9 = sadd.s32 1, %s3226_s26 }
  0x98   : > { %p31_p8 = scmp.eq.s32.totalorder %s30_s21, 0  ;;  %p40_p1 = scmp.ne.s32.totalorder %s3226_s26, %s3222_s25 }
  0x99   : > { %p41_p3 = scmp.eq.s32.totalorder %s3230_s27, 0  ;;  %p46_p13 = scmp.ne.s32.totalorder %s3222_s25, %s3218_s24 }
  0x9a   : > { %s3508_s13 = scalar_select %p31_p8, %s3226_s26, %s33_s9  }
  0x9b   : > { %p42_p0 = por %p41_p3, %p40_p1  ;;  %p4470_p2 = scmp.eq.s32.totalorder %s3330_s30, 0 }
  0x9c   : > { %p196_p6 = scmp.eq.s32.totalorder %s3330_s30, 1  ;;  %p202_p7 = scmp.eq.s32.totalorder %s2639_s19, 1 }
  0x9d   : > { %p3512_p5 = por %p4470_p2, %p46_p13  ;;  %p2856_p9 = scmp.lt.s32.totalorder %s3230_s27, 2 }
  0x9e   : > { %s296_s22 = sand.u32 1, %s3226_s26   ;;  %p3519_p4 = por %p196_p6, %p40_p1 }
  0x9f   : > { %p3523_p10 = por %p202_p7, %p46_p13  ;;  %s2790_s16 = smul.u32 88, %s296_s22 }
  0xa0   : > { %s4472_s12 = scalar_select %p3519_p4, 1, 0 }
  0xa1   : > { %s4473_s15 = scalar_select %p3523_p10, 1, 0 }
  0xa2   : > { %s2791_s17 = smul.u32 1408, %s3230_s27  ;;  %p3528_p11 = pnand %p2856_p9, %p42_p0 }
  0xa3   : > { %s300_s28 = scalar_lea.vmem [#allocation3], %s2790_s16  ;;  %s297_s19 = scalar_lea.sflag [#allocation4], %s296_s22 }
  0xa4   : > { %s3535_s23 = scalar_lea.hbm %s4426_s0, %s2791_s17  ;;  %s308_s14 = sshll.u32 %s300_s28, 4  ;;  %s3537_s14 = int_to_ptr.vmem [resolvable:$true] %s308_s14 }
  0xa5   : > { %s3122_s21 = scalar_lea.hbm %s3535_s23, 1408  ;;  %p3124_p8 = pneg %p3528_p11 }
  0xa6   : > { %p3123_p12 = scmp.ne.s32.totalorder %s3535_s23, %s3122_s21  ;;  %s3127_s20 = scalar_lea.hbm %s4426_s0, 2816 }
  0xa7   : > { %p3128_p13 = scmp.lt.u32.totalorder %s3535_s23, %s4426_s0  ;;  %p3129_p0 = scmp.lt.u32.totalorder %s3127_s20, %s3122_s21 }
  0xa8   : > { %p3125_p1 = pnand %p3124_p8, %p3123_p12  ;;  %p3131_p6 = scmp.lt.u32.totalorder %s3122_s21, %s3535_s23 }
  0xa9   : > { %p3130_p2 = por %p3129_p0, %p3128_p13 }
  0xaa   : > { %p3126_p3 = pneg %p3125_p1 }
  0xab   : > { %p3132_p7 = por %p3131_p6, %p3130_p2 }
  0xad   : > { %p3133_p9 = pnand %p3132_p7, %p3126_p3 }
  0xaf   : > { %3136 = shalt.err (!%p3133_p9)
}
  0xb0   : > { %s3137_s22 = scalar_lea.vmem %s3537_s14, 1408  ;;  %s3240_s16 = smov [#allocation3]  }
  0xb1   : > { %p3138_p12 = scmp.ne.s32.totalorder %s3537_s14, %s3137_s22  ;;  %s3142_s28 = sshll.u32 %s3240_s16, 4  ;;  %s3143_s28 = int_to_ptr.vmem [resolvable:$false] %s3142_s28 }
  0xb2   : > { %s3144_s1 = scalar_lea.vmem %s3143_s28, 2816  ;;  %p3145_p4 = scmp.lt.s32.totalorder %s3537_s14, %s3143_s28 }
  0xb3   : > { %p3140_p1 = pnand %p3138_p12, %p3124_p8  ;;  %p3146_p13 = scmp.lt.s32.totalorder %s3144_s1, %s3137_s22 }
  0xb5   : > { %p3141_p10 = pneg %p3140_p1  ;;  %p3147_p0 = por %p3146_p13, %p3145_p4 }
  0xb7   : > { %p3148_p2 = pnand %p3147_p0, %p3141_p10 }
  0xb9   : > { %3151 = shalt.err (!%p3148_p2)
}
  0xba   : > { %2845 = dma.hbm_to_vmem [thread:$0]  (!%p3528_p11), %s3535_s23, 1408, %s3537_s14, %s297_s19  }
  0xbb   : > { %p4475_p3 = scmp.ne.s32.totalorder %s4466_s8, 0 }
  0xbc   : > { %s3567_s21 = sand.u32 (!%p4475_p3), 1, %s3222_s25  }
  0xbd   : > { %317 = sbr.rel (%p4475_p3) target bundleno = 1008 (0x3f0), region = 48  ;;  %s320_s17 = scalar_lea.sflag (!%p4475_p3), [#allocation4], %s3567_s21 }
  0xbe   : > { %s2792_s9 = smul.u32 (!%p4475_p3), 88, %s3567_s21 }
  0xc0   : > { %s3571_s20 = scalar_lea.vmem (!%p4475_p3), [#allocation3], %s2792_s9 }
  0xc4   : > { %3197 = dma.done.wait (%p3512_p5), %s320_s17, 1408  }
  0xc5   : > { %3199 = vsyncadd (%p3512_p5), %s320_s17, 4294965888  ;;  %p4476_p4 = scmp.eq.s32.totalorder %s3330_s30, 0 }
  0xc7   : > { %3201 = dma.done.wait (%p4476_p4), [#allocation7], 768   ;;  %p4477_p10 = pmov %p4476_p4 }
  0xc8   : > { %p4478_p11 = pmov %p4476_p4 }
  0xc9   : > { %3203 = vsyncadd (%p4477_p10), [#allocation7], 4294966528 }
  0xca   : > { %3205 = dma.done.wait (%p4478_p11), [#allocation10], 768   ;;  %p4479_p8 = pmov %p4476_p4 }
  0xcb   : > { %p4480_p6 = pmov %p4476_p4 }
  0xcc   : > { %3207 = vsyncadd (%p4479_p8), [#allocation10], 4294966528 }
  0xcd   : > { %3209 = dma.done.wait (%p4480_p6), [#allocation13], 192   ;;  %p4481_p7 = pmov %p4476_p4 }
  0xce   : > { %v416_v0 = vld [vmem:[%s3571_s20 + $0x14] sm:$0xff]  ;;  %s3241_s8 = smov 126   ;;  %s3242_s29 = smov 4   ;;  %v3597_v2 = vld [vmem:[%s3571_s20 + $0x1c] sm:$0xff]  ;;  %v3610_v5 = vld [vmem:[%s3571_s20 + $0x24] sm:$0xff]  ;;  %vm399_vm0 = vcmask 1043456  }
  0xcf   : > { %3211 = vsyncadd (%p4481_p7), [#allocation13], 4294967104  ;;  %v3591_v1 = vld [vmem:[%s3571_s20 + $0x10] sm:$0xff]  ;;  %424 = vrot.lane.b32.xlu1 %v416_v0, %s3241_s8  ;;  %v3600_v3 = vld [vmem:[%s3571_s20 + $0x18] sm:$0xff]  ;;  %s3243_s18 = smov 120   ;;  %s3244_s23 = smov 76  }
  0xd0   : > { %387 = vrot.lane.b32.xlu0 %v3591_v1, %s3242_s29  ;;  %v3603_v4 = vld [vmem:[%s3571_s20] sm:$0xff]  ;;  %v3627_v7 = vld [vmem:[%s3571_s20 + $0x2c] sm:$0xff]  ;;  %s3245_s14 = smov 70   ;;  %s3246_s19 = smov 64   ;;  %v3654_v8 = vld [vmem:[%s3571_s20 + $0x34] sm:$0xff]  ;;  %vm437_vm1 = vcmask 1031168  }
  0xd1   : > { %v3613_v6 = vld [vmem:[%s3571_s20 + $0x20] sm:$0xff]  ;;  %s3247_s10 = smov 20   ;;  %s3248_s22 = smov 14   ;;  %v704_v9 = vld [vmem:[%s3571_s20 + $0x8] sm:$0xff]  ;;  %v3699_v10 = vld [vmem:[%s3571_s20 + $0x38] sm:$0xff]  ;;  %vm401_vm2 = vcmask 31744  }
  0xd2   : > { %s4440_s16 = smov 8   ;;  %s4443_s28 = smov 66   ;;  %v919_v11 = vld [vmem:[%s3571_s20 + $0x30] sm:$0xff]  ;;  %v3706_v12 = vld [vmem:[%s3571_s20 + $0x40] sm:$0xff]  ;;  %v3719_v13 = vld [vmem:[%s3571_s20 + $0x8] sm:$0xff]  ;;  %vm473_vm3 = vcmask 982016  }
  0xd3   : > { %426 = vrot.lane.b32.xlu1 %v3597_v2, %s3241_s8  ;;  %s4437_s1 = smov 54   ;;  %s4438_s9 = smov 42   ;;  %vm509_vm4 = vcmask 621568   ;;  %vm545_vm5 = vcmask 572416   ;;  %vm581_vm6 = vcmask 523264   ;;  %vm1128_vm7 = vcmask 719872  }
  0xd4   : > { %389 = vrot.lane.b32.xlu0 %v3600_v3, %s3242_s29  ;;  %s4439_s17 = smov 82   ;;  %vm617_vm8 = vcmask 162816   ;;  %vm653_vm9 = vcmask 113664   ;;  %vm689_vm10 = vcmask 64512   ;;  %vm725_vm11 = vcmask 539648   ;;  %p4519_p9 = scmp.ne.s32.totalorder %s4472_s12, 0 }
  0xd5   : > { %vm4449_vm12 = vcmask 441344   ;;  %vm797_vm13 = vcmask 343040   ;;  %vm4448_vm14 = vcmask 670720   ;;  %vm4451_vm15 = vcmask 474112  }
  0xd7   : > { %428 = vrot.lane.b32.xlu1 %v3610_v5, %s3241_s8 }
  0xd8   : > { %391 = vrot.lane.b32.xlu0 %v3613_v6, %s3242_s29 }
  0xdb   : > { %462 = vrot.lane.b32.xlu1 %v3597_v2, %s3243_s18 }
  0xdc   : > { %460 = vrot.lane.b32.xlu0 %v416_v0, %s3243_s18 }
  0xdf   : > { %498 = vrot.lane.b32.xlu1 %v3610_v5, %s3244_s23 }
  0xe0   : > { %496 = vrot.lane.b32.xlu0 %v3597_v2, %s3244_s23 }
  0xe3   : > { %500 = vrot.lane.b32.xlu1 %v3627_v7, %s3244_s23 }
  0xe4   : > { %464 = vrot.lane.b32.xlu0 %v3610_v5, %s3243_s18 }
  0xe7   : > { %534 = vrot.lane.b32.xlu1 %v3610_v5, %s3245_s14 }
  0xe8   : > { %532 = vrot.lane.b32.xlu0 %v3597_v2, %s3245_s14 }
  0xeb   : > { %570 = vrot.lane.b32.xlu1 %v3610_v5, %s3246_s19 }
  0xec   : > { %568 = vrot.lane.b32.xlu0 %v3597_v2, %s3246_s19 }
  0xef   : > { %572 = vrot.lane.b32.xlu1 %v3627_v7, %s3246_s19 }
  0xf0   : > { %536 = vrot.lane.b32.xlu0 %v3627_v7, %s3245_s14 }
  0xf3   : > { %606 = vrot.lane.b32.xlu1 %v3627_v7, %s3247_s10 }
  0xf4   : > { %604 = vrot.lane.b32.xlu0 %v3610_v5, %s3247_s10 }
  0xf7   : > { %642 = vrot.lane.b32.xlu1 %v3627_v7, %s3248_s22 }
  0xf8   : > { %640 = vrot.lane.b32.xlu0 %v3610_v5, %s3248_s22 }
  0xfb   : > { %644 = vrot.lane.b32.xlu1 %v3654_v8, %s3248_s22 }
  0xfc   : > { %608 = vrot.lane.b32.xlu0 %v3654_v8, %s3247_s10 }
  0xff   : > { %678 = vrot.lane.b32.xlu1 %v3627_v7, %s4440_s16 }
 0x100   : > { %676 = vrot.lane.b32.xlu0 %v3610_v5, %s4440_s16 }
 0x103   : > { %714 = vrot.lane.b32.xlu1 %v3591_v1, %s4443_s28 }
 0x104   : > { %712 = vrot.lane.b32.xlu0 %v704_v9, %s4443_s28 }
 0x107   : > { %716 = vrot.lane.b32.xlu1 %v3600_v3, %s4443_s28  ;;  %s4444_s28 = smov 88  }
 0x108   : > { %680 = vrot.lane.b32.xlu0 %v3654_v8, %s4440_s16  ;;  %s3257_s16 = smov 74  }
 0x10b   : > { %750 = vrot.lane.b32.xlu1 %v3591_v1, %s4437_s1 }
 0x10c   : > { %748 = vrot.lane.b32.xlu0 %v704_v9, %s4437_s1 }
 0x10f   : > { %786 = vrot.lane.b32.xlu1 %v3591_v1, %s4438_s9 }
 0x110   : > { %784 = vrot.lane.b32.xlu0 %v704_v9, %s4438_s9 }
 0x113   : > { %788 = vrot.lane.b32.xlu1 %v3600_v3, %s4438_s9  ;;  %s4442_s9 = smov 98  }
 0x114   : > { %752 = vrot.lane.b32.xlu0 %v3600_v3, %s4437_s1  ;;  %s4441_s1 = smov 58  }
 0x117   : > { %822 = vrot.lane.b32.xlu1 %v3610_v5, %s4439_s17 }
 0x118   : > { %820 = vrot.lane.b32.xlu0 %v3597_v2, %s4439_s17 }
 0x11b   : > { %858 = vrot.lane.b32.xlu1 %v3610_v5, %s3245_s14 }
 0x11c   : > { %856 = vrot.lane.b32.xlu0 %v3597_v2, %s3245_s14 }
 0x11f   : > { %860 = vrot.lane.b32.xlu1 %v3627_v7, %s3245_s14 }
 0x120   : > { %824 = vrot.lane.b32.xlu0 %v3627_v7, %s4439_s17  ;;  %s3256_s17 = smov 86  }
 0x123   : > { %893 = vrot.lane.b32.xlu1 %v3610_v5, %s4441_s1 }
 0x124   : > { %891 = vrot.lane.b32.xlu0 %v3597_v2, %s4441_s1 }
 0x127   : > { %929 = vrot.lane.b32.xlu1 %v3699_v10, %s4442_s9 }
 0x128   : > { %927 = vrot.lane.b32.xlu0 %v919_v11, %s4442_s9 }
 0x12b   : > { %931 = vrot.lane.b32.xlu1 %v3706_v12, %s4442_s9  ;;  %s4447_s9 = smov 92  }
 0x12c   : > { %895 = vrot.lane.b32.xlu0 %v3627_v7, %s4441_s1  ;;  %s4445_s1 = smov 110  }
 0x12f   : > { %965 = vrot.lane.b32.xlu1 %v3699_v10, %s3256_s17 }
 0x130   : > { %963 = vrot.lane.b32.xlu0 %v919_v11, %s3256_s17 }
 0x133   : > { %1001 = vrot.lane.b32.xlu1 %v3699_v10, %s3257_s16 }
 0x134   : > { %999 = vrot.lane.b32.xlu0 %v919_v11, %s3257_s16 }
 0x137   : > { %1003 = vrot.lane.b32.xlu1 %v3706_v12, %s3257_s16 }
 0x138   : > { %967 = vrot.lane.b32.xlu0 %v3706_v12, %s3256_s17 }
 0x13b   : > { %1045 = vrot.lane.b32.xlu1 %v704_v9, %s4445_s1 }
 0x13c   : > { %1043 = vrot.lane.b32.xlu0 %v3603_v4, %s4445_s1 }
 0x13f   : > { %1079 = vrot.lane.b32.xlu1 %v3603_v4, %s4447_s9 }
 0x140   : > { %1047 = vrot.lane.b32.xlu0 %v3591_v1, %s4445_s1  ;;  %s3262_s1 = smov 48  }
 0x141   : > { %v425_v14 = vpop.permute.xlu1 %424 }
 0x142   : > { %v388_v15 = vpop.permute.xlu0 %387  ;;  %v432_v18 = vrot.slane %v425_v14, 4 }
 0x143   : > { %1115 = vrot.lane.b32.xlu1 %v3597_v2, %s4444_s28  ;;  %v395_v19 = vrot.slane %v388_v15, 4 }
 0x144   : > { %1081 = vrot.lane.b32.xlu0 %v704_v9, %s4447_s9 }
 0x145   : > { %v427_v16 = vpop.permute.xlu1 %426 }
 0x146   : > { %v390_v17 = vpop.permute.xlu0 %389  ;;  %v433_v20 = vrot.slane %v427_v16, 4 }
 0x147   : > { %v396_v21 = vrot.slane %v390_v17, 4  ;;  %1083 = vrot.lane.b32.xlu1 %v3591_v1, %s4447_s9  ;;  %s3264_s9 = smov 12  }
 0x148   : > { %1117 = vrot.lane.b32.xlu0 %v3610_v5, %s4444_s28  ;;  %v436_v22 = vsel %vm399_vm0, %v432_v18, %v433_v20 }
 0x149   : > { %v400_v23 = vsel %vm399_vm0, %v395_v19, %v396_v21  ;;  %v438_v24 = vsel %vm437_vm1, %v425_v14, %v436_v22  ;;  %v3743_v26 = vpop.permute.xlu1 %428 }
 0x14a   : > { %v402_v25 = vsel %vm401_vm2, %v388_v15, %v400_v23  ;;  %v3745_v27 = vpop.permute.xlu0 %391  ;;  %v434_v28 = vrot.slane %v3743_v26, 4 }
 0x14b   : > { %v397_v29 = vrot.slane %v3745_v27, 4  ;;  %v2661_v30 = vcombine.high %v402_v25, %v438_v24  ;;  %v2660_v31 = vcombine.low %v402_v25, %v438_v24  ;;  %1151 = vrot.lane.b32.xlu1 %v3597_v2, %s3245_s14  ;;  %v2933_v25 = vld [vmem:[#allocation6 + $0x4] ss:$8 sps:$4 sm:$0xff]  }
 0x14c   : > { %1119 = vrot.lane.b32.xlu0 %v3627_v7, %s4444_s28  ;;  %v439_v32 = vsel %vm399_vm0, %v433_v20, %v434_v28  ;;  %s4446_s28 = smov 52   ;;  %2759 = vmatprep.mubr.msk.bf16.mxu0 %vm1128_vm7, %v2933_v25 }
 0x14d   : > { %v403_v33 = vsel %vm399_vm0, %v396_v21, %v397_v29  ;;  %1981 = vmatprep.subr.bf16.mxu0 %v2661_v30  ;;  %v440_v34 = vsel %vm437_vm1, %v427_v16, %v439_v32  ;;  %v463_v36 = vpop.permute.xlu1 %462  ;;  %2762 = vmatprep.mubr.msk.bf16.mxu1 %vm1128_vm7, %v2933_v25 }
 0x14e   : > { %v404_v35 = vsel %vm401_vm2, %v390_v17, %v403_v33  ;;  %v461_v37 = vpop.permute.xlu0 %460  ;;  %1982 = vmatpush1.bf16.msra.mxu0 %v2660_v31  ;;  %v469_v38 = vrot.slane %v463_v36, 4 }
 0x14f   : > { %v468_v39 = vrot.slane %v461_v37, 4  ;;  %v2663_v40 = vcombine.high %v404_v35, %v440_v34  ;;  %v2662_v41 = vcombine.low %v404_v35, %v440_v34  ;;  %1186 = vrot.lane.b32.xlu1 %v3597_v2, %s4446_s28 }
 0x150   : > { %1153 = vrot.lane.b32.xlu0 %v3610_v5, %s3245_s14 }
 0x151   : > { %v472_v42 = vsel %vm399_vm0, %v468_v39, %v469_v38  ;;  %2032 = vmatprep.subr.bf16.mxu1 %v2663_v40  ;;  %v499_v44 = vpop.permute.xlu1 %498  ;;  %v382_v40 = vld [vmem:[%s3571_s20 + $0x28] sm:$0xff] }
 0x152   : > { %v474_v43 = vsel %vm473_vm3, %v461_v37, %v472_v42  ;;  %v497_v45 = vpop.permute.xlu0 %496  ;;  %2033 = vmatpush1.bf16.msra.mxu1 %v2662_v41  ;;  %v505_v46 = vrot.slane %v499_v44, 4 }
 0x153   : > { %v504_v47 = vrot.slane %v497_v45, 4  ;;  %1155 = vrot.lane.b32.xlu1 %v3627_v7, %s3245_s14 }
 0x154   : > { %1188 = vrot.lane.b32.xlu0 %v3610_v5, %s4446_s28  ;;  %v3797_v5 = vld [vmem:[%s3571_s20 + $0x48] sm:$0xff] }
 0x155   : > { %v508_v48 = vsel %vm399_vm0, %v504_v47, %v505_v46  ;;  %v3773_v50 = vpop.permute.xlu1 %500 }
 0x156   : > { %v510_v49 = vsel %vm509_vm4, %v497_v45, %v508_v48  ;;  %v3775_v51 = vpop.permute.xlu0 %464  ;;  %v506_v52 = vrot.slane %v3773_v50, 4 }
 0x157   : > { %v470_v53 = vrot.slane %v3775_v51, 4  ;;  %v2668_v54 = vcombine.high %v474_v43, %v510_v49  ;;  %v2667_v55 = vcombine.low %v474_v43, %v510_v49  ;;  %1222 = vrot.lane.b32.xlu1 %v3699_v10, %s3262_s1 }
 0x158   : > { %1190 = vrot.lane.b32.xlu0 %v3627_v7, %s4446_s28  ;;  %v511_v56 = vsel %vm399_vm0, %v505_v46, %v506_v52  ;;  %s3263_s28 = smov 30   ;;  %v3265_v46 = vmov 0  }
 0x159   : > { %v475_v57 = vsel %vm399_vm0, %v469_v38, %v470_v53  ;;  %1983 = vmatprep.subr.bf16.mxu0 %v2668_v54  ;;  %v512_v58 = vsel %vm509_vm4, %v499_v44, %v511_v56  ;;  %v535_v60 = vpop.permute.xlu1 %534  ;;  %2932 = vset.pattern.permute.xlu1 %v3265_v46 }
 0x15a   : > { %v476_v59 = vsel %vm473_vm3, %v463_v36, %v475_v57  ;;  %v533_v61 = vpop.permute.xlu0 %532  ;;  %1984 = vmatpush1.bf16.msra.mxu0 %v2667_v55  ;;  %v541_v62 = vrot.slane %v535_v60, 4  ;;  %2931 = vset.pattern.permute.xlu0 %v3265_v46 }
 0x15b   : > { %v540_v63 = vrot.slane %v533_v61, 4  ;;  %v2670_v0 = vcombine.high %v476_v59, %v512_v58  ;;  %v2669_v1 = vcombine.low %v476_v59, %v512_v58  ;;  %1258 = vrot.lane.b32.xlu1 %v3699_v10, %s3263_s28 }
 0x15c   : > { %1224 = vrot.lane.b32.xlu0 %v3706_v12, %s3262_s1 }
 0x15d   : > { %v544_v2 = vsel %vm399_vm0, %v540_v63, %v541_v62  ;;  %2034 = vmatprep.subr.bf16.mxu1 %v2670_v0  ;;  %v571_v11 = vpop.permute.xlu1 %570 }
 0x15e   : > { %v546_v9 = vsel %vm545_vm5, %v533_v61, %v544_v2  ;;  %v569_v14 = vpop.permute.xlu0 %568  ;;  %2035 = vmatpush1.bf16.msra.mxu1 %v2669_v1  ;;  %v577_v15 = vrot.slane %v571_v11, 4 }
 0x15f   : > { %v576_v16 = vrot.slane %v569_v14, 4  ;;  %1226 = vrot.lane.b32.xlu1 %v3797_v5, %s3262_s1 }
 0x160   : > { %1260 = vrot.lane.b32.xlu0 %v3706_v12, %s3263_s28 }
 0x161   : > { %v580_v17 = vsel %vm399_vm0, %v576_v16, %v577_v15  ;;  %v3806_v19 = vpop.permute.xlu1 %572 }
 0x162   : > { %v582_v18 = vsel %vm581_vm6, %v569_v14, %v580_v17  ;;  %v3808_v20 = vpop.permute.xlu0 %536  ;;  %v578_v21 = vrot.slane %v3806_v19, 4 }
 0x163   : > { %v542_v22 = vrot.slane %v3808_v20, 4  ;;  %v2675_v23 = vcombine.high %v546_v9, %v582_v18  ;;  %v2674_v24 = vcombine.low %v546_v9, %v582_v18  ;;  %1294 = vrot.lane.b32.xlu1 %v3699_v10, %s3264_s9 }
 0x164   : > { %1262 = vrot.lane.b32.xlu0 %v3797_v5, %s3263_s28  ;;  %v583_v30 = vsel %vm399_vm0, %v577_v15, %v578_v21 }
 0x165   : > { %v547_v31 = vsel %vm399_vm0, %v541_v62, %v542_v22  ;;  %1985 = vmatprep.subr.bf16.mxu0 %v2675_v23  ;;  %v584_v32 = vsel %vm581_vm6, %v571_v11, %v583_v30  ;;  %v607_v33 = vpop.permute.xlu1 %606  ;;  %v635_v11 = vld [vmem:[%s3571_s20 + $0x3c] sm:$0xff] }
 0x166   : > { %v548_v10 = vsel %vm545_vm5, %v535_v60, %v547_v31  ;;  %v605_v34 = vpop.permute.xlu0 %604  ;;  %1986 = vmatpush1.bf16.msra.mxu0 %v2674_v24  ;;  %v613_v35 = vrot.slane %v607_v33, 4 }
 0x167   : > { %v612_v36 = vrot.slane %v605_v34, 4  ;;  %v2677_v37 = vcombine.high %v548_v10, %v584_v32  ;;  %v2676_v38 = vcombine.low %v548_v10, %v584_v32  ;;  %1298 = vrot.lane.b32.xlu1 %v3797_v5, %s3264_s9 }
 0x168   : > { %1296 = vrot.lane.b32.xlu0 %v3706_v12, %s3264_s9 }
 0x169   : > { %v616_v39 = vsel %vm399_vm0, %v612_v36, %v613_v35  ;;  %2036 = vmatprep.subr.bf16.mxu1 %v2677_v37  ;;  %v643_v42 = vpop.permute.xlu1 %642 }
 0x16a   : > { %v618_v41 = vsel %vm617_vm8, %v605_v34, %v616_v39  ;;  %v641_v43 = vpop.permute.xlu0 %640  ;;  %2037 = vmatpush1.bf16.msra.mxu1 %v2676_v38  ;;  %v649_v44 = vrot.slane %v643_v42, 4 }
 0x16b   : > { %v648_v45 = vrot.slane %v641_v43, 4  ;;  %430 = vrot.lane.b32.xlu1 %v3627_v7, %s3241_s8  ;;  %s4482_s8 = smov 66  }
 0x16c   : > { %393 = vrot.lane.b32.xlu0 %v382_v40, %s3242_s29  ;;  %s4483_s29 = smov 8  }
 0x16d   : > { %v652_v12 = vsel %vm399_vm0, %v648_v45, %v649_v44  ;;  %v3840_v48 = vpop.permute.xlu1 %644 }
 0x16e   : > { %v654_v47 = vsel %vm653_vm9, %v641_v43, %v652_v12  ;;  %v3842_v49 = vpop.permute.xlu0 %608  ;;  %v650_v54 = vrot.slane %v3840_v48, 4 }
 0x16f   : > { %v614_v55 = vrot.slane %v3842_v49, 4  ;;  %v2682_v56 = vcombine.high %v618_v41, %v654_v47  ;;  %v2681_v57 = vcombine.low %v618_v41, %v654_v47  ;;  %502 = vrot.lane.b32.xlu1 %v3654_v8, %s3244_s23  ;;  %s4485_s23 = smov 54  }
 0x170   : > { %466 = vrot.lane.b32.xlu0 %v3627_v7, %s3243_s18  ;;  %v655_v58 = vsel %vm399_vm0, %v649_v44, %v650_v54  ;;  %s4484_s18 = smov 42  }
 0x171   : > { %v619_v59 = vsel %vm399_vm0, %v613_v35, %v614_v55  ;;  %1987 = vmatprep.subr.bf16.mxu0 %v2682_v56  ;;  %v656_v60 = vsel %vm653_vm9, %v643_v42, %v655_v58  ;;  %v679_v62 = vpop.permute.xlu1 %678 }
 0x172   : > { %v620_v61 = vsel %vm617_vm8, %v607_v33, %v619_v59  ;;  %v677_v63 = vpop.permute.xlu0 %676  ;;  %1988 = vmatpush1.bf16.msra.mxu0 %v2681_v57  ;;  %v685_v0 = vrot.slane %v679_v62, 4 }
 0x173   : > { %v684_v7 = vrot.slane %v677_v63, 4  ;;  %v2684_v1 = vcombine.high %v620_v61, %v656_v60  ;;  %v2683_v2 = vcombine.low %v620_v61, %v656_v60  ;;  %574 = vrot.lane.b32.xlu1 %v3654_v8, %s3246_s19  ;;  %s4486_s19 = smov 82   ;;  %v1030_v61 = vld [vmem:[%s3571_s20 + $0x18] sm:$0xf] }
 0x174   : > { %538 = vrot.lane.b32.xlu0 %v3654_v8, %s3245_s14  ;;  %1034 = vst [vmem:[#allocation2 + $0x210] sm:$0xf] %v1030_v61 }
 0x175   : > { %v688_v9 = vsel %vm399_vm0, %v684_v7, %v685_v0  ;;  %2038 = vmatprep.subr.bf16.mxu1 %v2684_v1  ;;  %v715_v15 = vpop.permute.xlu1 %714  ;;  %v1029_v1 = vld [vmem:[%s3571_s20 + $0x10] sm:$0xff] }
 0x176   : > { %v690_v14 = vsel %vm689_vm10, %v677_v63, %v688_v9  ;;  %v713_v16 = vpop.permute.xlu0 %712  ;;  %2039 = vmatpush1.bf16.msra.mxu1 %v2683_v2  ;;  %v721_v17 = vrot.slane %v715_v15, 4  ;;  %1033 = vst [vmem:[#allocation2 + $0x208] sm:$0xff] %v1029_v1 }
 0x177   : > { %v720_v18 = vrot.slane %v713_v16, 4  ;;  %646 = vrot.lane.b32.xlu1 %v635_v11, %s3248_s22  ;;  %s4488_s22 = smov 58  }
 0x178   : > { %610 = vrot.lane.b32.xlu0 %v635_v11, %s3247_s10  ;;  %s4487_s10 = smov 98  }
 0x179   : > { %v724_v23 = vsel %vm399_vm0, %v720_v18, %v721_v17  ;;  %v3869_v25 = vpop.permute.xlu1 %716 }
 0x17a   : > { %v726_v24 = vsel %vm725_vm11, %v713_v16, %v724_v23  ;;  %v3871_v30 = vpop.permute.xlu0 %680  ;;  %v722_v31 = vrot.slane %v3869_v25, 4 }
 0x17b   : > { %v686_v32 = vrot.slane %v3871_v30, 4  ;;  %v2689_v10 = vcombine.high %v690_v14, %v726_v24  ;;  %v2688_v33 = vcombine.low %v690_v14, %v726_v24  ;;  %718 = vrot.lane.b32.xlu1 %v3613_v6, %s4482_s8  ;;  %s4489_s8 = smov 92  }
 0x17c   : > { %682 = vrot.lane.b32.xlu0 %v635_v11, %s4483_s29  ;;  %v727_v34 = vsel %vm399_vm0, %v721_v17, %v722_v31  ;;  %s4490_s29 = smov 110  }
 0x17d   : > { %v691_v35 = vsel %vm399_vm0, %v685_v0, %v686_v32  ;;  %1989 = vmatprep.subr.bf16.mxu0 %v2689_v10  ;;  %v728_v36 = vsel %vm725_vm11, %v715_v15, %v727_v34  ;;  %v751_v38 = vpop.permute.xlu1 %750 }
 0x17e   : > { %v692_v37 = vsel %vm689_vm10, %v679_v62, %v691_v35  ;;  %v749_v39 = vpop.permute.xlu0 %748  ;;  %1990 = vmatpush1.bf16.msra.mxu0 %v2688_v33  ;;  %v757_v40 = vrot.slane %v751_v38, 4 }
 0x17f   : > { %v756_v41 = vrot.slane %v749_v39, 4  ;;  %v2691_v42 = vcombine.high %v692_v37, %v728_v36  ;;  %v2690_v43 = vcombine.low %v692_v37, %v728_v36  ;;  %790 = vrot.lane.b32.xlu1 %v3613_v6, %s4484_s18 }
 0x180   : > { %754 = vrot.lane.b32.xlu0 %v3613_v6, %s4485_s23 }
 0x181   : > { %v760_v44 = vsel %vm399_vm0, %v756_v41, %v757_v40  ;;  %2040 = vmatprep.subr.bf16.mxu1 %v2691_v42  ;;  %v787_v12 = vpop.permute.xlu1 %786 }
 0x182   : > { %v762_v45 = vsel %vm4449_vm12, %v749_v39, %v760_v44  ;;  %v785_v47 = vpop.permute.xlu0 %784  ;;  %2041 = vmatpush1.bf16.msra.mxu1 %v2690_v43  ;;  %v793_v56 = vrot.slane %v787_v12, 4 }
 0x183   : > { %v792_v57 = vrot.slane %v785_v47, 4  ;;  %862 = vrot.lane.b32.xlu1 %v3654_v8, %s3245_s14 }
 0x184   : > { %826 = vrot.lane.b32.xlu0 %v3654_v8, %s4486_s19 }
 0x185   : > { %v796_v6 = vsel %vm399_vm0, %v792_v57, %v793_v56  ;;  %v3898_v59 = vpop.permute.xlu1 %788 }
 0x186   : > { %v798_v58 = vsel %vm797_vm13, %v785_v47, %v796_v6  ;;  %v3900_v60 = vpop.permute.xlu0 %752  ;;  %v794_v62 = vrot.slane %v3898_v59, 4 }
 0x187   : > { %v758_v63 = vrot.slane %v3900_v60, 4  ;;  %v2696_v0 = vcombine.high %v762_v45, %v798_v58  ;;  %v2695_v7 = vcombine.low %v762_v45, %v798_v58  ;;  %933 = vrot.lane.b32.xlu1 %v3797_v5, %s4487_s10  ;;  %s3268_s10 = smov [#allocation15]  }
 0x188   : > { %897 = vrot.lane.b32.xlu0 %v3654_v8, %s4488_s22  ;;  %v799_v2 = vsel %vm399_vm0, %v793_v56, %v794_v62  ;;  %s3156_s22 = sshll.u32 %s3268_s10, 4  ;;  %s3157_s22 = int_to_ptr.vmem [resolvable:$false] %s3156_s22 }
 0x189   : > { %v763_v9 = vsel %vm399_vm0, %v757_v40, %v758_v63  ;;  %1991 = vmatprep.subr.bf16.mxu0 %v2696_v0  ;;  %v800_v11 = vsel %vm797_vm13, %v787_v12, %v799_v2  ;;  %v823_v15 = vpop.permute.xlu1 %822  ;;  %v1217_v12 = vld [vmem:[%s3571_s20 + $0x50] sm:$0xff]  ;;  %s2793_s20 = smul.u32 56, %s3567_s21 }
 0x18a   : > { %v764_v14 = vsel %vm4449_vm12, %v751_v38, %v763_v9  ;;  %v821_v16 = vpop.permute.xlu0 %820  ;;  %1992 = vmatpush1.bf16.msra.mxu0 %v2695_v7  ;;  %v829_v17 = vrot.slane %v823_v15, 4  ;;  %vm4452_vm12 = vcmask 703488  }
 0x18b   : > { %v828_v18 = vrot.slane %v821_v16, 4  ;;  %v2698_v23 = vcombine.high %v764_v14, %v800_v11  ;;  %v2697_v24 = vcombine.low %v764_v14, %v800_v11  ;;  %1005 = vrot.lane.b32.xlu1 %v3797_v5, %s3257_s16  ;;  %s4491_s16 = smov 88  }
 0x18c   : > { %969 = vrot.lane.b32.xlu0 %v3797_v5, %s3256_s17 }
 0x18d   : > { %v832_v10 = vsel %vm399_vm0, %v828_v18, %v829_v17  ;;  %2042 = vmatprep.subr.bf16.mxu1 %v2698_v23  ;;  %v859_v34 = vpop.permute.xlu1 %858 }
 0x18e   : > { %v834_v33 = vsel %vm4448_vm14, %v821_v16, %v832_v10  ;;  %v857_v35 = vpop.permute.xlu0 %856  ;;  %2043 = vmatpush1.bf16.msra.mxu1 %v2697_v24  ;;  %v865_v36 = vrot.slane %v859_v34, 4 }
 0x18f   : > { %v864_v37 = vrot.slane %v857_v35, 4  ;;  %1085 = vrot.lane.b32.xlu1 %v3600_v3, %s4489_s8  ;;  %s3158_s8 = scalar_lea.vmem %s3157_s22, 1792 }
 0x190   : > { %1049 = vrot.lane.b32.xlu0 %v3600_v3, %s4490_s29 }
 0x191   : > { %v868_v38 = vsel %vm399_vm0, %v864_v37, %v865_v36  ;;  %v3930_v39 = vpop.permute.xlu1 %860 }
 0x192   : > { %v869_v5 = vsel %vm545_vm5, %v857_v35, %v868_v38  ;;  %v3932_v40 = vpop.permute.xlu0 %824  ;;  %v866_v41 = vrot.slane %v3930_v39, 4 }
 0x193   : > { %v830_v42 = vrot.slane %v3932_v40, 4  ;;  %v2703_v43 = vcombine.high %v834_v33, %v869_v5  ;;  %v2702_v44 = vcombine.low %v834_v33, %v869_v5  ;;  %1157 = vrot.lane.b32.xlu1 %v3654_v8, %s3245_s14  ;;  %s4492_s14 = smov 52  }
 0x194   : > { %1121 = vrot.lane.b32.xlu0 %v3654_v8, %s4491_s16  ;;  %v870_v3 = vsel %vm399_vm0, %v865_v36, %v866_v41 }
 0x195   : > { %v835_v45 = vsel %vm399_vm0, %v829_v17, %v830_v42  ;;  %1993 = vmatprep.subr.bf16.mxu0 %v2703_v43  ;;  %v871_v47 = vsel %vm545_vm5, %v859_v34, %v870_v3  ;;  %v894_v57 = vpop.permute.xlu1 %893 }
 0x196   : > { %v836_v56 = vsel %vm4448_vm14, %v823_v15, %v835_v45  ;;  %v892_v6 = vpop.permute.xlu0 %891  ;;  %1994 = vmatpush1.bf16.msra.mxu0 %v2702_v44  ;;  %v900_v58 = vrot.slane %v894_v57, 4  ;;  %vm4450_vm14 = vcmask 801792  }
 0x197   : > { %v899_v61 = vrot.slane %v892_v6, 4  ;;  %v2705_v0 = vcombine.high %v836_v56, %v871_v47  ;;  %v2704_v7 = vcombine.low %v836_v56, %v871_v47  ;;  %1228 = vrot.lane.b32.xlu1 %v1217_v12, %s3262_s1  ;;  %s2794_s1 = smul.u32 896, %s3330_s30  ;;  %s2498_s30 = scalar_lea.sflag [#allocation5], %s3567_s21 }
 0x198   : > { %1192 = vrot.lane.b32.xlu0 %v3654_v8, %s4492_s14 }
 0x199   : > { %v903_v1 = vsel %vm399_vm0, %v899_v61, %v900_v58  ;;  %2044 = vmatprep.subr.bf16.mxu1 %v2705_v0  ;;  %v930_v9 = vpop.permute.xlu1 %929  ;;  %s4382_s23 = scalar_lea.hbm %s4433_s7, %s2794_s1 }
 0x19a   : > { %v905_v2 = vsel %vm4451_vm15, %v892_v6, %v903_v1  ;;  %v928_v11 = vpop.permute.xlu0 %927  ;;  %2045 = vmatpush1.bf16.msra.mxu1 %v2704_v7  ;;  %v936_v14 = vrot.slane %v930_v9, 4 }
 0x19b   : > { %v935_v15 = vrot.slane %v928_v11, 4  ;;  %1300 = vrot.lane.b32.xlu1 %v1217_v12, %s3264_s9 }
 0x19c   : > { %1264 = vrot.lane.b32.xlu0 %v1217_v12, %s3263_s28  ;;  %s377_s28 = scalar_lea.vmem [#allocation15], %s2793_s20 }
 0x19d   : > { %v939_v16 = vsel %vm399_vm0, %v935_v15, %v936_v14  ;;  %v3958_v8 = vpop.permute.xlu1 %931  ;;  %s2512_s9 = sshll.u32 %s377_s28, 4  ;;  %s4384_s9 = int_to_ptr.vmem [resolvable:$true] %s2512_s9 }
 0x19e   : > { %v941_v17 = vsel %vm4450_vm14, %v928_v11, %v939_v16  ;;  %v3960_v18 = vpop.permute.xlu0 %895  ;;  %v937_v23 = vrot.slane %v3958_v8, 4  ;;  %s3152_s19 = scalar_lea.vmem %s4384_s9, 896  ;;  %p3159_p13 = scmp.lt.s32.totalorder %s4384_s9, %s3157_s22 }
 0x19f   : > { %v901_v24 = vrot.slane %v3960_v18, 4  ;;  %v2710_v10 = vcombine.high %v905_v2, %v941_v17  ;;  %v2709_v33 = vcombine.low %v905_v2, %v941_v17  ;;  %v1434_v2 = vld [vmem:[#allocation8 + $0x8] sm:$0xff]  ;;  %v1435_v17 = vld [vmem:[#allocation8 + $0x10] sm:$0xff]  ;;  %p3153_p5 = scmp.ne.s32.totalorder %s4384_s9, %s3152_s19  ;;  %p3160_p0 = scmp.lt.s32.totalorder %s3158_s8, %s3152_s19 }
 0x1a0   : > { %v942_v34 = vsel %vm399_vm0, %v936_v14, %v937_v23  ;;  %1443 = vperm.xlu1 %2932, %v1434_v2   ;;  %v2243_v2 = vld [vmem:[#allocation11 + $0x8] sm:$0xff] }
 0x1a1   : > { %v906_v35 = vsel %vm399_vm0, %v900_v58, %v901_v24  ;;  %1995 = vmatprep.subr.bf16.mxu0 %v2710_v10  ;;  %v943_v36 = vsel %vm4450_vm14, %v930_v9, %v942_v34  ;;  %v966_v38 = vpop.permute.xlu1 %965  ;;  %vm1012_vm14 = vcmask 605184   ;;  %v1433_v9 = vld [vmem:[#allocation8] sm:$0xff]  ;;  %v2203_v10 = vld [vmem:[#allocation9] sm:$0xff]  ;;  %p3154_p12 = pnand %p3153_p5, %p4519_p9  ;;  %p3161_p2 = por %p3160_p0, %p3159_p13 }
 0x1a2   : > { %v907_v37 = vsel %vm4451_vm15, %v894_v57, %v906_v35  ;;  %v964_v5 = vpop.permute.xlu0 %963  ;;  %1996 = vmatpush1.bf16.msra.mxu0 %v2709_v33  ;;  %v972_v43 = vrot.slane %v966_v38, 4  ;;  %1438 = vperm.xlu0 %2931, %v1433_v9   ;;  %vm4453_vm15 = vcmask 900096   ;;  %v2205_v9 = vld [vmem:[#allocation9 + $0x10] sm:$0xff] }
 0x1a3   : > { %v971_v44 = vrot.slane %v964_v5, 4  ;;  %v2712_v3 = vcombine.high %v907_v37, %v943_v36  ;;  %v2711_v45 = vcombine.low %v907_v37, %v943_v36  ;;  %p3155_p1 = pneg %p3154_p12 }
 0x1a4   : > { %1448 = vperm.xlu1 %2932, %v1435_v17  }
 0x1a5   : > { %v975_v12 = vsel %vm399_vm0, %v971_v44, %v972_v43  ;;  %2046 = vmatprep.subr.bf16.mxu1 %v2712_v3  ;;  %v1002_v56 = vpop.permute.xlu1 %1001  ;;  %p3162_p3 = pnand %p3161_p2, %p3155_p1 }
 0x1a6   : > { %v977_v47 = vsel %vm4452_vm12, %v964_v5, %v975_v12  ;;  %v1000_v6 = vpop.permute.xlu0 %999  ;;  %2047 = vmatpush1.bf16.msra.mxu1 %v2711_v45  ;;  %v1008_v58 = vrot.slane %v1002_v56, 4  ;;  %2208 = vperm.xlu0 %2931, %v2203_v10  }
 0x1a7   : > { %v1007_v61 = vrot.slane %v1000_v6, 4 }
 0x1a9   : > { %v1011_v57 = vsel %vm399_vm0, %v1007_v61, %v1008_v58  ;;  %v3976_v7 = vpop.permute.xlu1 %1003 }
 0x1aa   : > { %v1013_v0 = vsel %vm1012_vm14, %v1000_v6, %v1011_v57  ;;  %v3978_v1 = vpop.permute.xlu0 %967  ;;  %v1009_v11 = vrot.slane %v3976_v7, 4  ;;  %v2242_v6 = vld [vmem:[#allocation11] sm:$0xff] }
 0x1ab   : > { %v4464_v14 = vrot.slane %v3978_v1, 4  ;;  %v2717_v15 = vcombine.high %v977_v47, %v1013_v0  ;;  %v2716_v16 = vcombine.low %v977_v47, %v1013_v0  ;;  %v2204_v47 = vld [vmem:[#allocation9 + $0x8] sm:$0xff]  ;;  %2247 = vperm.xlu0 %2931, %v2242_v6  }
 0x1ac   : > { %v1014_v33 = vsel %vm399_vm0, %v1008_v58, %v1009_v11  ;;  %2213 = vperm.xlu1 %2932, %v2204_v47  }
 0x1ad   : > { %v978_v34 = vsel %vm399_vm0, %v972_v43, %v4464_v14  ;;  %1997 = vmatprep.subr.bf16.mxu0 %v2717_v15  ;;  %v1015_v35 = vsel %vm1012_vm14, %v1002_v56, %v1014_v33  ;;  %v1046_v37 = vpop.permute.xlu1 %1045 }
 0x1ae   : > { %v979_v36 = vsel %vm4452_vm12, %v966_v38, %v978_v34  ;;  %v1044_v5 = vpop.permute.xlu0 %1043  ;;  %1998 = vmatpush1.bf16.msra.mxu0 %v2716_v16  ;;  %v1052_v44 = vrot.slane %v1046_v37, 4  ;;  %vm4454_vm12 = vcmask 752640  }
 0x1af   : > { %v1051_v3 = vrot.slane %v1044_v5, 4  ;;  %v2719_v45 = vcombine.high %v979_v36, %v1015_v35  ;;  %v2718_v12 = vcombine.low %v979_v36, %v1015_v35  ;;  %2218 = vperm.xlu0 %2931, %v2205_v9   ;;  %v2244_v36 = vld [vmem:[#allocation11 + $0x10] sm:$0xff] }
 0x1b0   : > { %2252 = vperm.xlu1 %2932, %v2243_v2  }
 0x1b1   : > { %v1055_v58 = vsel %vm399_vm0, %v1051_v3, %v1052_v44  ;;  %2048 = vmatprep.subr.bf16.mxu1 %v2719_v45  ;;  %v1080_v56 = vpop.permute.xlu1 %1079 }
 0x1b2   : > { %v1057_v43 = vsel %vm4453_vm15, %v1044_v5, %v1055_v58  ;;  %v3992_v61 = vpop.permute.xlu0 %1047  ;;  %2049 = vmatpush1.bf16.msra.mxu1 %v2718_v12  ;;  %v1087_v33 = vrot.slane %v1080_v56, 4  ;;  %v2296_v5 = vld [vmem:[#allocation14] sm:$0xff] }
 0x1b3   : > { %v4462_v38 = vrot.slane %v3992_v61, 4  ;;  %v2724_v57 = vcombine.high %v3603_v4, %v1057_v43  ;;  %v2723_v0 = vcombine.low %v3603_v4, %v1057_v43  ;;  %2299 = vperm.xlu0 %2931, %v2296_v5  }
 0x1b4   : > { %2257 = vperm.xlu1 %2932, %v2244_v36  }
 0x1b5   : > { %v1058_v15 = vsel %vm399_vm0, %v1052_v44, %v4462_v38  ;;  %1999 = vmatprep.subr.bf16.mxu0 %v2724_v57  ;;  %v1116_v17 = vpop.permute.xlu1 %1115 }
 0x1b6   : > { %v1059_v16 = vsel %vm4453_vm15, %v1046_v37, %v1058_v15  ;;  %v1082_v10 = vpop.permute.xlu0 %1081  ;;  %2000 = vmatpush1.bf16.msra.mxu0 %v2723_v0  ;;  %v1123_v12 = vrot.slane %v1116_v17, 4  ;;  %vm4456_vm15 = vcmask 424960  }
 0x1b7   : > { %v1088_v34 = vrot.slane %v1082_v10, 4  ;;  %v2726_v35 = vcombine.high %v3719_v13, %v1059_v16  ;;  %v2725_v4 = vcombine.low %v3719_v13, %v1059_v16 }
 0x1b9   : > { %v1091_v3 = vsel %vm399_vm0, %v1087_v33, %v1088_v34  ;;  %2050 = vmatprep.subr.bf16.mxu1 %v2726_v35  ;;  %v4005_v37 = vpop.permute.xlu1 %1083 }
 0x1ba   : > { %v1093_v44 = vsel %vm4454_vm12, %v1080_v56, %v1091_v3  ;;  %v1118_v45 = vpop.permute.xlu0 %1117  ;;  %2051 = vmatpush1.bf16.msra.mxu1 %v2725_v4  ;;  %v4463_v47 = vrot.slane %v4005_v37, 4 }
 0x1bb   : > { %v1124_v6 = vrot.slane %v1118_v45, 4 }
 0x1bc   : > { %v1094_v13 = vsel %vm399_vm0, %v1088_v34, %v4463_v47 }
 0x1bd   : > { %v1127_v58 = vsel %vm399_vm0, %v1123_v12, %v1124_v6  ;;  %v1095_v43 = vsel %vm4454_vm12, %v1082_v10, %v1094_v13  ;;  %v1152_v57 = vpop.permute.xlu1 %1151  ;;  %vm4459_vm12 = vcmask 392192  }
 0x1be   : > { %v1129_v56 = vsel %vm1128_vm7, %v1116_v17, %v1127_v58  ;;  %v4014_v0 = vpop.permute.xlu0 %1119  ;;  %v1159_v10 = vrot.slane %v1152_v57, 4 }
 0x1bf   : > { %v4455_v2 = vrot.slane %v4014_v0, 4  ;;  %v2731_v9 = vcombine.high %v1093_v44, %v1129_v56  ;;  %v2730_v15 = vcombine.low %v1093_v44, %v1129_v56 }
 0x1c1   : > { %v1130_v16 = vsel %vm399_vm0, %v1124_v6, %v4455_v2  ;;  %2001 = vmatprep.subr.bf16.mxu0 %v2731_v9  ;;  %v1187_v34 = vpop.permute.xlu1 %1186 }
 0x1c2   : > { %v1131_v33 = vsel %vm1128_vm7, %v1118_v45, %v1130_v16  ;;  %v1154_v35 = vpop.permute.xlu0 %1153  ;;  %2002 = vmatpush1.bf16.msra.mxu0 %v2730_v15  ;;  %v1194_v6 = vrot.slane %v1187_v34, 4 }
 0x1c3   : > { %v1160_v4 = vrot.slane %v1154_v35, 4  ;;  %v2733_v17 = vcombine.high %v1095_v43, %v1131_v33  ;;  %v2732_v36 = vcombine.low %v1095_v43, %v1131_v33 }
 0x1c5   : > { %v1163_v5 = vsel %vm399_vm0, %v1159_v10, %v1160_v4  ;;  %2052 = vmatprep.subr.bf16.mxu1 %v2733_v17  ;;  %v4023_v44 = vpop.permute.xlu1 %1155 }
 0x1c6   : > { %v1164_v3 = vsel %vm545_vm5, %v1152_v57, %v1163_v5  ;;  %v1189_v12 = vpop.permute.xlu0 %1188  ;;  %2053 = vmatpush1.bf16.msra.mxu1 %v2732_v36  ;;  %v4458_v13 = vrot.slane %v4023_v44, 4 }
 0x1c7   : > { %v1195_v45 = vrot.slane %v1189_v12, 4 }
 0x1c8   : > { %v1165_v58 = vsel %vm399_vm0, %v1160_v4, %v4458_v13 }
 0x1c9   : > { %v1198_v43 = vsel %vm399_vm0, %v1194_v6, %v1195_v45  ;;  %v1166_v56 = vsel %vm545_vm5, %v1154_v35, %v1165_v58  ;;  %v1223_v57 = vpop.permute.xlu1 %1222 }
 0x1ca   : > { %v1200_v9 = vsel %vm4456_vm15, %v1187_v34, %v1198_v43  ;;  %v4032_v15 = vpop.permute.xlu0 %1190  ;;  %v1230_v35 = vrot.slane %v1223_v57, 4 }
 0x1cb   : > { %v4457_v16 = vrot.slane %v4032_v15, 4  ;;  %v2738_v33 = vcombine.high %v1164_v3, %v1200_v9  ;;  %v2737_v10 = vcombine.low %v1164_v3, %v1200_v9 }
 0x1cd   : > { %v1201_v17 = vsel %vm399_vm0, %v1195_v45, %v4457_v16  ;;  %2003 = vmatprep.subr.bf16.mxu0 %v2738_v33  ;;  %v1259_v36 = vpop.permute.xlu1 %1258 }
 0x1ce   : > { %v1202_v4 = vsel %vm4456_vm15, %v1189_v12, %v1201_v17  ;;  %v1225_v5 = vpop.permute.xlu0 %1224  ;;  %2004 = vmatpush1.bf16.msra.mxu0 %v2737_v10  ;;  %v1266_v45 = vrot.slane %v1259_v36, 4  ;;  %vm1271_vm15 = vcmask 244736  }
 0x1cf   : > { %v1231_v34 = vrot.slane %v1225_v5, 4  ;;  %v2740_v6 = vcombine.high %v1166_v56, %v1202_v4  ;;  %v2739_v58 = vcombine.low %v1166_v56, %v1202_v4 }
 0x1d1   : > { %v1234_v43 = vsel %vm399_vm0, %v1230_v35, %v1231_v34  ;;  %2054 = vmatprep.subr.bf16.mxu1 %v2740_v6  ;;  %v4041_v9 = vpop.permute.xlu1 %1226 }
 0x1d2   : > { %v1236_v3 = vsel %vm4459_vm12, %v1223_v57, %v1234_v43  ;;  %v1261_v2 = vpop.permute.xlu0 %1260  ;;  %2055 = vmatpush1.bf16.msra.mxu1 %v2739_v58  ;;  %v4460_v12 = vrot.slane %v4041_v9, 4 }
 0x1d3   : > { %v1267_v33 = vrot.slane %v1261_v2, 4 }
 0x1d4   : > { %v1237_v10 = vsel %vm399_vm0, %v1231_v34, %v4460_v12 }
 0x1d5   : > { %v1270_v56 = vsel %vm399_vm0, %v1266_v45, %v1267_v33  ;;  %v1238_v17 = vsel %vm4459_vm12, %v1225_v5, %v1237_v10  ;;  %v1295_v57 = vpop.permute.xlu1 %1294  ;;  %vm1307_vm12 = vcmask 97280  }
 0x1d6   : > { %v1272_v4 = vsel %vm1271_vm15, %v1259_v36, %v1270_v56  ;;  %v4050_v35 = vpop.permute.xlu0 %1262  ;;  %v1302_v13 = vrot.slane %v1295_v57, 4 }
 0x1d7   : > { %v4461_v6 = vrot.slane %v4050_v35, 4  ;;  %v2745_v58 = vcombine.high %v1236_v3, %v1272_v4  ;;  %v2744_v43 = vcombine.low %v1236_v3, %v1272_v4  ;;  %v4064_v4 = vld [vmem:[#allocation6 + $0x10] sm:$0xff] }
 0x1d8   : > { %v4070_v14 = vcombine.high %v4064_v4, %v4064_v4 }
 0x1d9   : > { %v1273_v16 = vsel %vm399_vm0, %v1267_v33, %v4461_v6  ;;  %2005 = vmatprep.subr.bf16.mxu0 %v2745_v58  ;;  %v4057_v45 = vpop.permute.xlu1 %1298 }
 0x1da   : > { %v1274_v34 = vsel %vm1271_vm15, %v1261_v2, %v1273_v16  ;;  %v1297_v5 = vpop.permute.xlu0 %1296  ;;  %2006 = vmatpush1.bf16.msra.mxu0 %v2744_v43  ;;  %v1304_v36 = vrot.slane %v4057_v45, 4 }
 0x1db   : > { %v1303_v10 = vrot.slane %v1297_v5, 4  ;;  %v2747_v56 = vcombine.high %v1238_v17, %v1274_v34  ;;  %v2746_v12 = vcombine.low %v1238_v17, %v1274_v34 }
 0x1dd   : > { %v1306_v3 = vsel %vm399_vm0, %v1302_v13, %v1303_v10  ;;  %v1309_v33 = vsel %vm399_vm0, %v1303_v10, %v1304_v36  ;;  %2056 = vmatprep.subr.bf16.mxu1 %v2747_v56  ;;  %v431_v58 = vpop.permute.xlu1 %430 }
 0x1de   : > { %v1308_v2 = vsel %vm1307_vm12, %v1295_v57, %v1306_v3  ;;  %v1310_v16 = vsel %vm1307_vm12, %v1297_v5, %v1309_v33  ;;  %v394_v43 = vpop.permute.xlu0 %393  ;;  %2057 = vmatpush1.bf16.msra.mxu1 %v2746_v12  ;;  %v435_v6 = vrot.slane %v431_v58, 4 }
 0x1df   : > { %v398_v38 = vrot.slane %v394_v43, 4  ;;  %v2752_v47 = vcombine.high %v1308_v2, %v1308_v2  ;;  %v2754_v17 = vcombine.high %v1310_v16, %v1310_v16  ;;  %v2751_v34 = vcombine.low %v1308_v2, %v1308_v2  ;;  %v4088_v2 = vld [vmem:[#allocation6] ss:$8 sps:$4 sm:$0xff]  }
 0x1e0   : > { %v2753_v13 = vcombine.low %v1310_v16, %v1310_v16  ;;  %v441_v10 = vsel %vm399_vm0, %v434_v28, %v435_v6  ;;  %v443_v57 = vsel %vm437_vm1, %v431_v58, %v435_v6 }
 0x1e1   : > { %v405_v12 = vsel %vm399_vm0, %v397_v29, %v398_v38  ;;  %v407_v5 = vsel %vm401_vm2, %v394_v43, %v398_v38  ;;  %2758 = vmatprep.subr.msk.bf16.mxu0 %vm399_vm0, %v2752_v47  ;;  %v442_v56 = vsel %vm437_vm1, %v3743_v26, %v441_v10  ;;  %451 = vst [vmem:[#allocation2 + $0x34] sm:$0xf] %v443_v57  ;;  %v503_v33 = vpop.permute.xlu1 %502  ;;  %v1961_v6 = vsel %vm399_vm0, %v2751_v34, 0 }
 0x1e2   : > { %v406_v3 = vsel %vm401_vm2, %v3745_v27, %v405_v12  ;;  %415 = vst [vmem:[#allocation2 + $0x18] sm:$0xf] %v407_v5  ;;  %v467_v28 = vpop.permute.xlu0 %466  ;;  %2761 = vmatprep.subr.msk.bf16.mxu1 %vm399_vm0, %v2754_v17  ;;  %v1967_v29 = vsel %vm399_vm0, %v2753_v13, 0  ;;  %v507_v38 = vrot.slane %v503_v33, 4  ;;  %2008 = vmatpush1.bf16.msra.mxu0 %v1961_v6  ;;  %vm4493_vm1 = vcmask 441344  }
 0x1e3   : > { %v471_v47 = vrot.slane %v467_v28, 4  ;;  %2059 = vmatpush1.bf16.msra.mxu1 %v1967_v29  ;;  %v2664_v26 = vcombine.low %v406_v3, %v442_v56  ;;  %v2665_v16 = vcombine.high %v406_v3, %v442_v56  ;;  %vm4494_vm2 = vmmov %vm4493_vm1 }
 0x1e4   : > { %2134 = vmatprep.subr.bf16.mxu1 %v3265_v46  ;;  %v513_v27 = vsel %vm399_vm0, %v506_v52, %v507_v38  ;;  %v515_v58 = vsel %vm509_vm4, %v503_v33, %v507_v38  ;;  %v4123_v38 = vcombine.low %v4064_v4, %v4064_v4 }
 0x1e5   : > { %v477_v43 = vsel %vm399_vm0, %v470_v53, %v471_v47  ;;  %v479_v17 = vsel %vm473_vm3, %v467_v28, %v471_v47  ;;  %2083 = vmatprep.subr.bf16.mxu0 %v2665_v16  ;;  %v514_v34 = vsel %vm509_vm4, %v3773_v50, %v513_v27  ;;  %523 = vst [vmem:[#allocation2 + $0x6c] sm:$0xf] %v515_v58  ;;  %v575_v10 = vpop.permute.xlu1 %574 }
 0x1e6   : > { %v478_v13 = vsel %vm473_vm3, %v3775_v51, %v477_v43  ;;  %487 = vst [vmem:[#allocation2 + $0x50] sm:$0xf] %v479_v17  ;;  %v539_v57 = vpop.permute.xlu0 %538  ;;  %2014 = vmatmul.mubr.bf16.vlgmr.msra.gmra.mrb[0].mxu0 %v4088_v2  ;;  %2065 = vmatmul.mubr.bf16.vlgmr.msra.gmra.mrb[0].mxu1 %v4088_v2  ;;  %v579_v52 = vrot.slane %v575_v10, 4  ;;  %vm4495_vm3 = vcmask 670720  }
 0x1e7   : > { %v543_v12 = vrot.slane %v539_v57, 4  ;;  %2084 = vmatpush1.bf16.msra.mxu0 %v2664_v26  ;;  %v2671_v53 = vcombine.low %v478_v13, %v514_v34  ;;  %v2672_v5 = vcombine.high %v478_v13, %v514_v34  ;;  %2760 = vmatprep.mubr.msk.bf16.mxu0 %vm1128_vm7, %v4070_v14  ;;  %vm4496_vm4 = vmmov %vm4495_vm3 }
 0x1e8   : > { %2763 = vmatprep.mubr.msk.bf16.mxu1 %vm1128_vm7, %v4070_v14  ;;  %v585_v50 = vsel %vm399_vm0, %v578_v21, %v579_v52  ;;  %v587_v51 = vsel %vm581_vm6, %v575_v10, %v579_v52 }
 0x1e9   : > { %v549_v56 = vsel %vm399_vm0, %v542_v22, %v543_v12  ;;  %v551_v3 = vsel %vm545_vm5, %v539_v57, %v543_v12  ;;  %v2936_v33 = vld [vmem:[#allocation2 + $0x18] ss:$28 sps:$4 sm:$0xff]   ;;  %2085 = vmatprep.subr.bf16.mxu0 %v2672_v5  ;;  %v586_v28 = vsel %vm581_vm6, %v3806_v19, %v585_v50  ;;  %595 = vst [vmem:[#allocation2 + $0xa4] sm:$0xf] %v587_v51  ;;  %v647_v29 = vpop.permute.xlu1 %646  ;;  %vm4497_vm6 = vcmask 801792  }
 0x1ea   : > { %v550_v6 = vsel %vm545_vm5, %v3808_v20, %v549_v56  ;;  %559 = vst [vmem:[#allocation2 + $0x88] sm:$0xf] %v551_v3  ;;  %v611_v21 = vpop.permute.xlu0 %610  ;;  %v651_v47 = vrot.slane %v647_v29, 4  ;;  %2135 = vmatpush1.bf16.msra.mxu1 %v2936_v33 }
 0x1eb   : > { %v615_v22 = vrot.slane %v611_v21, 4  ;;  %2086 = vmatpush1.bf16.msra.mxu0 %v2671_v53  ;;  %v2678_v26 = vcombine.low %v550_v6, %v586_v28  ;;  %v2679_v16 = vcombine.high %v550_v6, %v586_v28  ;;  %2136 = vmatprep.subr.bf16.mxu1 %v3265_v46 }
 0x1ec   : > { %v657_v19 = vsel %vm399_vm0, %v650_v54, %v651_v47  ;;  %v659_v20 = vsel %vm653_vm9, %v647_v29, %v651_v47 }
 0x1ed   : > { %v621_v27 = vsel %vm399_vm0, %v614_v55, %v615_v22  ;;  %v623_v4 = vsel %vm617_vm8, %v611_v21, %v615_v22  ;;  %v2937_v58 = vld [vmem:[#allocation2 + $0x50] ss:$28 sps:$4 sm:$0xff]   ;;  %2087 = vmatprep.subr.bf16.mxu0 %v2679_v16  ;;  %v658_v43 = vsel %vm653_vm9, %v3840_v48, %v657_v19  ;;  %667 = vst [vmem:[#allocation2 + $0xdc] sm:$0xf] %v659_v20  ;;  %v719_v34 = vpop.permute.xlu1 %718  ;;  %vm4499_vm9 = vmmov %vm4497_vm6 }
 0x1ee   : > { %v622_v17 = vsel %vm617_vm8, %v3842_v49, %v621_v27  ;;  %631 = vst [vmem:[#allocation2 + $0xc0] sm:$0xf] %v623_v4  ;;  %v683_v54 = vpop.permute.xlu0 %682  ;;  %2024 = vmatmul.mubr.bf16.gmra.mrb[4].mxu0 %v4123_v38  ;;  %2075 = vmatmul.mubr.bf16.gmra.mrb[4].mxu1 %v4123_v38  ;;  %v723_v13 = vrot.slane %v719_v34, 4  ;;  %v2952_v48 = vld [vmem:[#allocation6 + $0x4] ss:$8 sps:$4 sm:$0xff]   ;;  %vm4498_vm8 = vcmask 474112  }
 0x1ef   : > { %v687_v55 = vrot.slane %v683_v54, 4  ;;  %2137 = vmatpush1.bf16.msra.mxu1 %v2937_v58  ;;  %2088 = vmatpush1.bf16.msra.mxu0 %v2678_v26  ;;  %v2685_v10 = vcombine.low %v622_v17, %v658_v43  ;;  %v2686_v57 = vcombine.high %v622_v17, %v658_v43 }
 0x1f0   : > { %2138 = vmatprep.subr.bf16.mxu1 %v3265_v46  ;;  %2765 = vmatprep.mubr.msk.bf16.mxu0 %vm1128_vm7, %v2952_v48  ;;  %v729_v49 = vsel %vm399_vm0, %v722_v31, %v723_v13  ;;  %v731_v52 = vsel %vm725_vm11, %v719_v34, %v723_v13 }
 0x1f1   : > { %v693_v12 = vsel %vm399_vm0, %v686_v32, %v687_v55  ;;  %v695_v53 = vsel %vm689_vm10, %v683_v54, %v687_v55  ;;  %v2940_v5 = vld [vmem:[#allocation2 + $0x88] ss:$28 sps:$4 sm:$0xff]   ;;  %2089 = vmatprep.subr.bf16.mxu0 %v2686_v57  ;;  %v730_v50 = vsel %vm725_vm11, %v3869_v25, %v729_v49  ;;  %739 = vst [vmem:[#allocation2 + $0x114] sm:$0xf] %v731_v52  ;;  %v791_v56 = vpop.permute.xlu1 %790  ;;  %vm4502_vm11 = vcmask 703488  }
 0x1f2   : > { %v694_v51 = vsel %vm689_vm10, %v3871_v30, %v693_v12  ;;  %703 = vst [vmem:[#allocation2 + $0xf8] sm:$0xf] %v695_v53  ;;  %v755_v31 = vpop.permute.xlu0 %754  ;;  %2767 = vmatprep.mubr.msk.bf16.mxu1 %vm1128_vm7, %v2952_v48  ;;  %v795_v3 = vrot.slane %v791_v56, 4  ;;  %vm4500_vm10 = vmmov %vm4498_vm8 }
 0x1f3   : > { %v759_v33 = vrot.slane %v755_v31, 4  ;;  %2139 = vmatpush1.bf16.msra.mxu1 %v2940_v5  ;;  %2090 = vmatpush1.bf16.msra.mxu0 %v2685_v10  ;;  %v2692_v32 = vcombine.low %v694_v51, %v730_v50  ;;  %v2693_v28 = vcombine.high %v694_v51, %v730_v50 }
 0x1f4   : > { %2140 = vmatprep.subr.bf16.mxu1 %v3265_v46  ;;  %v801_v25 = vsel %vm399_vm0, %v794_v62, %v795_v3  ;;  %v803_v6 = vsel %vm797_vm13, %v791_v56, %v795_v3  ;;  %v4501_v56 = vrot.slane %v3978_v1, 4 }
 0x1f5   : > { %v765_v30 = vsel %vm399_vm0, %v758_v63, %v759_v33  ;;  %v767_v29 = vsel %vm4493_vm1, %v755_v31, %v759_v33  ;;  %v2941_v21 = vld [vmem:[#allocation2 + $0xc0] ss:$28 sps:$4 sm:$0xff]   ;;  %2091 = vmatprep.subr.bf16.mxu0 %v2693_v28  ;;  %v802_v47 = vsel %vm797_vm13, %v3898_v59, %v801_v25  ;;  %811 = vst [vmem:[#allocation2 + $0x14c] sm:$0xf] %v803_v6  ;;  %v863_v26 = vpop.permute.xlu1 %862  ;;  %vm4503_vm13 = vmmov %vm4502_vm11  ;;  %vm4507_vm1 = vcmask 900096  }
 0x1f6   : > { %v766_v22 = vsel %vm4494_vm2, %v3900_v60, %v765_v30  ;;  %775 = vst [vmem:[#allocation2 + $0x130] sm:$0xf] %v767_v29  ;;  %v827_v62 = vpop.permute.xlu0 %826  ;;  %v867_v16 = vrot.slane %v863_v26, 4 }
 0x1f7   : > { %v831_v19 = vrot.slane %v827_v62, 4  ;;  %2141 = vmatpush1.bf16.msra.mxu1 %v2941_v21  ;;  %2092 = vmatpush1.bf16.msra.mxu0 %v2692_v32  ;;  %v2699_v20 = vcombine.low %v766_v22, %v802_v47  ;;  %v2700_v63 = vcombine.high %v766_v22, %v802_v47  ;;  %v4504_v21 = vrot.slane %v4005_v37, 4 }
 0x1f8   : > { %2142 = vmatprep.subr.bf16.mxu1 %v3265_v46  ;;  %v872_v27 = vsel %vm399_vm0, %v866_v41, %v867_v16  ;;  %v874_v59 = vsel %vm545_vm5, %v863_v26, %v867_v16  ;;  %v4506_v22 = vrot.slane %v3992_v61, 4 }
 0x1f9   : > { %v837_v60 = vsel %vm399_vm0, %v830_v42, %v831_v19  ;;  %v839_v4 = vsel %vm4495_vm3, %v827_v62, %v831_v19  ;;  %v2942_v58 = vld [vmem:[#allocation2 + $0xf8] ss:$28 sps:$4 sm:$0xff]   ;;  %2093 = vmatprep.subr.bf16.mxu0 %v2700_v63  ;;  %v873_v43 = vsel %vm545_vm5, %v3930_v39, %v872_v27  ;;  %882 = vst [vmem:[#allocation2 + $0x184] sm:$0xf] %v874_v59  ;;  %v934_v34 = vpop.permute.xlu1 %933  ;;  %vm4509_vm3 = vmmov %vm4507_vm1 }
 0x1fa   : > { %v838_v17 = vsel %vm4496_vm4, %v3932_v40, %v837_v60  ;;  %847 = vst [vmem:[#allocation2 + $0x168] sm:$0xf] %v839_v4  ;;  %v898_v41 = vpop.permute.xlu0 %897  ;;  %v938_v54 = vrot.slane %v934_v34, 4  ;;  %v2953_v60 = vld [vmem:[#allocation2 + $0x208] sm:$0xff]  ;;  %vm4515_vm4 = vcmask 424960  }
 0x1fb   : > { %v902_v13 = vrot.slane %v898_v41, 4  ;;  %2143 = vmatpush1.bf16.msra.mxu1 %v2942_v58  ;;  %2094 = vmatpush1.bf16.msra.mxu0 %v2699_v20  ;;  %v2706_v55 = vcombine.low %v838_v17, %v873_v43  ;;  %v2707_v42 = vcombine.high %v838_v17, %v873_v43  ;;  %v4510_v43 = vrot.slane %v4023_v44, 4 }
 0x1fc   : > { %2144 = vmatprep.subr.bf16.mxu1 %v3265_v46  ;;  %v944_v10 = vsel %vm399_vm0, %v937_v23, %v938_v54  ;;  %v946_v39 = vsel %vm4497_vm6, %v934_v34, %v938_v54 }
 0x1fd   : > { %v908_v40 = vsel %vm399_vm0, %v901_v24, %v902_v13  ;;  %v910_v57 = vsel %vm4498_vm8, %v898_v41, %v902_v13  ;;  %v2943_v48 = vld [vmem:[#allocation2 + $0x130] ss:$28 sps:$4 sm:$0xff]   ;;  %2095 = vmatprep.subr.bf16.mxu0 %v2707_v42  ;;  %v945_v49 = vsel %vm4499_vm9, %v3958_v8, %v944_v10  ;;  %954 = vst [vmem:[#allocation2 + $0x1bc] sm:$0xf] %v946_v39  ;;  %v1006_v12 = vpop.permute.xlu1 %1005  ;;  %vm4517_vm8 = vmmov %vm4515_vm4 }
 0x1fe   : > { %v909_v52 = vsel %vm4500_vm10, %v3960_v18, %v908_v40  ;;  %918 = vst [vmem:[#allocation2 + $0x1a0] sm:$0xf] %v910_v57  ;;  %v970_v23 = vpop.permute.xlu0 %969  ;;  %v1010_v53 = vrot.slane %v1006_v12, 4 }
 0x1ff   : > { %v974_v5 = vrot.slane %v970_v23, 4  ;;  %2145 = vmatpush1.bf16.msra.mxu1 %v2943_v48  ;;  %2096 = vmatpush1.bf16.msra.mxu0 %v2706_v55  ;;  %v2713_v50 = vcombine.low %v909_v52, %v945_v49  ;;  %v2714_v24 = vcombine.high %v909_v52, %v945_v49  ;;  %v4512_v49 = vrot.slane %v4041_v9, 4 }
 0x200   : > { %2146 = vmatprep.subr.bf16.mxu1 %v3265_v46  ;;  %v1016_v51 = vsel %vm399_vm0, %v1009_v11, %v1010_v53  ;;  %v1018_v8 = vsel %vm1012_vm14, %v1006_v12, %v1010_v53  ;;  %v4514_v12 = vrot.slane %v4032_v15, 4 }
 0x201   : > { %v980_v18 = vsel %vm399_vm0, %v4501_v56, %v974_v5  ;;  %v982_v31 = vsel %vm4502_vm11, %v970_v23, %v974_v5  ;;  %v2944_v3 = vld [vmem:[#allocation2 + $0x168] ss:$28 sps:$4 sm:$0xff]   ;;  %2097 = vmatprep.subr.bf16.mxu0 %v2714_v24  ;;  %v1017_v33 = vsel %vm1012_vm14, %v3976_v7, %v1016_v51  ;;  %1026 = vst [vmem:[#allocation2 + $0x1f4] sm:$0xf] %v1018_v8  ;;  %v1086_v28 = vpop.permute.xlu1 %1085  ;;  %vm4505_vm14 = vcmask 752640  }
 0x202   : > { %v981_v32 = vsel %vm4503_vm13, %v3978_v1, %v980_v18  ;;  %990 = vst [vmem:[#allocation2 + $0x1d8] sm:$0xf] %v982_v31  ;;  %v1050_v11 = vpop.permute.xlu0 %1049  ;;  %v1090_v25 = vrot.slane %v1086_v28, 4  ;;  %vm4508_vm2 = vmmov %vm4505_vm14 }
 0x203   : > { %v1054_v6 = vrot.slane %v1050_v11, 4  ;;  %2147 = vmatpush1.bf16.msra.mxu1 %v2944_v3  ;;  %2098 = vmatpush1.bf16.msra.mxu0 %v2713_v50  ;;  %v2720_v30 = vcombine.low %v981_v32, %v1017_v33  ;;  %v2721_v29 = vcombine.high %v981_v32, %v1017_v33  ;;  %v4518_v33 = vrot.slane %v4050_v35, 4 }
 0x204   : > { %2148 = vmatprep.subr.bf16.mxu1 %v3265_v46  ;;  %v1096_v47 = vsel %vm399_vm0, %v4504_v21, %v1090_v25  ;;  %v1098_v7 = vsel %vm4505_vm14, %v1086_v28, %v1090_v25 }
 0x205   : > { %v1060_v1 = vsel %vm399_vm0, %v4506_v22, %v1054_v6  ;;  %v1062_v26 = vsel %vm4507_vm1, %v1050_v11, %v1054_v6  ;;  %v2945_v62 = vld [vmem:[#allocation2 + $0x1a0] ss:$28 sps:$4 sm:$0xff]   ;;  %2099 = vmatprep.subr.bf16.mxu0 %v2721_v29  ;;  %v1097_v16 = vsel %vm4508_vm2, %v4005_v37, %v1096_v47  ;;  %1106 = vst [vmem:[#allocation2 + $0x248] sm:$0xf] %v1098_v7  ;;  %v1158_v20 = vpop.permute.xlu1 %1157 }
 0x206   : > { %v1061_v19 = vsel %vm4509_vm3, %v3992_v61, %v1060_v1  ;;  %1070 = vst [vmem:[#allocation2 + $0x22c] sm:$0xf] %v1062_v26  ;;  %v1122_v63 = vpop.permute.xlu0 %1121  ;;  %v1162_v27 = vrot.slane %v1158_v20, 4  ;;  %v4511_v61 = vrot.slane %v4014_v0, 4 }
 0x207   : > { %v1126_v59 = vrot.slane %v1122_v63, 4  ;;  %2149 = vmatpush1.bf16.msra.mxu1 %v2945_v62  ;;  %2100 = vmatpush1.bf16.msra.mxu0 %v2720_v30  ;;  %v2727_v4 = vcombine.low %v2953_v60, %v1061_v19  ;;  %v2728_v58 = vcombine.high %v2953_v60, %v1061_v19 }
 0x208   : > { %2150 = vmatprep.subr.bf16.mxu1 %v3265_v46  ;;  %v1167_v37 = vsel %vm399_vm0, %v4510_v43, %v1162_v27  ;;  %v1169_v17 = vsel %vm545_vm5, %v1158_v20, %v1162_v27 }
 0x209   : > { %v1132_v34 = vsel %vm399_vm0, %v4511_v61, %v1126_v59  ;;  %v1134_v41 = vsel %vm1128_vm7, %v1122_v63, %v1126_v59  ;;  %v2946_v54 = vld [vmem:[#allocation2 + $0x1d8] ss:$28 sps:$4 sm:$0xff]   ;;  %2101 = vmatprep.subr.bf16.mxu0 %v2728_v58  ;;  %v1168_v13 = vsel %vm545_vm5, %v4023_v44, %v1167_v37  ;;  %1177 = vst [vmem:[#allocation2 + $0x280] sm:$0xf] %v1169_v17  ;;  %v1229_v42 = vpop.permute.xlu1 %1228  ;;  %vm4513_vm5 = vcmask 392192  }
 0x20a   : > { %v1133_v55 = vsel %vm1128_vm7, %v4014_v0, %v1132_v34  ;;  %1142 = vst [vmem:[#allocation2 + $0x264] sm:$0xf] %v1134_v41  ;;  %v1193_v10 = vpop.permute.xlu0 %1192  ;;  %v1233_v39 = vrot.slane %v1229_v42, 4  ;;  %vm4516_vm6 = vmmov %vm4513_vm5 }
 0x20b   : > { %v1197_v40 = vrot.slane %v1193_v10, 4  ;;  %2151 = vmatpush1.bf16.msra.mxu1 %v2946_v54  ;;  %2102 = vmatpush1.bf16.msra.mxu0 %v2727_v4  ;;  %v2734_v57 = vcombine.low %v1097_v16, %v1133_v55  ;;  %v2735_v48 = vcombine.high %v1097_v16, %v1133_v55 }
 0x20c   : > { %2152 = vmatprep.subr.bf16.mxu1 %v3265_v46  ;;  %v1239_v52 = vsel %vm399_vm0, %v4512_v49, %v1233_v39  ;;  %v1241_v44 = vsel %vm4513_vm5, %v1229_v42, %v1233_v39 }
 0x20d   : > { %v1203_v0 = vsel %vm399_vm0, %v4514_v12, %v1197_v40  ;;  %v1205_v23 = vsel %vm4515_vm4, %v1193_v10, %v1197_v40  ;;  %v2947_v53 = vld [vmem:[#allocation2 + $0x210] ss:$28 sps:$4 sm:$0xff]   ;;  %2103 = vmatprep.subr.bf16.mxu0 %v2735_v48  ;;  %v1240_v5 = vsel %vm4516_vm6, %v4041_v9, %v1239_v52  ;;  %1249 = vst [vmem:[#allocation2 + $0x2b8] sm:$0xf] %v1241_v44  ;;  %v1301_v24 = vpop.permute.xlu1 %1300 }
 0x20e   : > { %v1204_v50 = vsel %vm4517_vm8, %v4032_v15, %v1203_v0  ;;  %1213 = vst [vmem:[#allocation2 + $0x29c] sm:$0xf] %v1205_v23  ;;  %v1265_v51 = vpop.permute.xlu0 %1264  ;;  %v1305_v8 = vrot.slane %v1301_v24, 4 }
 0x20f   : > { %v1269_v56 = vrot.slane %v1265_v51, 4  ;;  %2153 = vmatpush1.bf16.msra.mxu1 %v2947_v53  ;;  %2104 = vmatpush1.bf16.msra.mxu0 %v2734_v57  ;;  %v2741_v18 = vcombine.low %v1168_v13, %v1204_v50  ;;  %v2742_v31 = vcombine.high %v1168_v13, %v1204_v50 }
 0x210   : > { %2154 = vmatprep.subr.bf16.mxu1 %v3265_v46  ;;  %v1311_v3 = vsel %vm399_vm0, %v1304_v36, %v1305_v8  ;;  %v1313_v9 = vsel %vm1307_vm12, %v1301_v24, %v1305_v8 }
 0x211   : > { %v1275_v15 = vsel %vm399_vm0, %v4518_v33, %v1269_v56  ;;  %v1277_v32 = vsel %vm1271_vm15, %v1265_v51, %v1269_v56  ;;  %v2948_v28 = vld [vmem:[#allocation2 + $0x248] ss:$28 sps:$4 sm:$0xff]   ;;  %2105 = vmatprep.subr.bf16.mxu0 %v2742_v31  ;;  %v1312_v11 = vsel %vm1307_vm12, %v4057_v45, %v1311_v3  ;;  %1321 = vst [vmem:[#allocation2 + $0x2f0] sm:$0xf] %v1313_v9  ;;  %vm3267_vm12 = vmmov 0  }
 0x212   : > { %v1276_v25 = vsel %vm1271_vm15, %v4050_v35, %v1275_v15  ;;  %1285 = vst [vmem:[#allocation2 + $0x2d4] sm:$0xf] %v1277_v32  ;;  %v2756_v29 = vcombine.high %v1312_v11, %v1312_v11  ;;  %v2755_v21 = vcombine.low %v1312_v11, %v1312_v11 }
 0x213   : > { %2155 = vmatpush1.bf16.msra.mxu1 %v2948_v28  ;;  %2106 = vmatpush1.bf16.msra.mxu0 %v2741_v18  ;;  %v2748_v36 = vcombine.low %v1240_v5, %v1276_v25  ;;  %v2749_v6 = vcombine.high %v1240_v5, %v1276_v25 }
 0x214   : > { %2156 = vmatprep.subr.bf16.mxu1 %v3265_v46  ;;  %v1973_v35 = vsel %vm399_vm0, %v2755_v21, 0 }
 0x215   : > { %v2949_v30 = vld [vmem:[#allocation2 + $0x280] ss:$28 sps:$4 sm:$0xff]   ;;  %2107 = vmatprep.subr.bf16.mxu0 %v2749_v6 }
 0x217   : > { %2157 = vmatpush1.bf16.msra.mxu1 %v2949_v30  ;;  %2108 = vmatpush1.bf16.msra.mxu0 %v2748_v36 }
 0x218   : > { %2158 = vmatprep.subr.bf16.mxu1 %v3265_v46  ;;  %2764 = vmatprep.subr.msk.bf16.mxu0 %vm399_vm0, %v2756_v29  ;;  %v2951_v47 = vld [vmem:[#allocation2 + $0x2f0] ss:$0 sps:$4 sm:$0xff]  }
 0x219   : > { %v2950_v45 = vld [vmem:[#allocation2 + $0x2b8] ss:$28 sps:$4 sm:$0xff]   ;;  %v1979_v7 = vsel %vm399_vm0, %v2951_v47, 0 }
 0x21b   : > { %2159 = vmatpush1.bf16.msra.mxu1 %v2950_v45  ;;  %2110 = vmatpush1.bf16.msra.mxu0 %v1973_v35 }
 0x21c   : > { %2160 = vmatprep.subr.bf16.mxu1 %v3265_v46 }
 0x21e   : > { %2116 = vmatmul.mubr.bf16.vlgmr.msra.gmra.mrb[8].mxu0 %v4088_v2 }
 0x21f   : > { %2161 = vmatpush1.bf16.msra.mxu1 %v1979_v7  ;;  %2766 = vmatprep.mubr.msk.bf16.mxu0 %vm1128_vm7, %v4070_v14  ;;  %v4275_v22 = vpop.permute.xlu1 %1443 }
 0x221   : > { %v4277_v1 = vpop.permute.xlu0 %1438 }
 0x222   : > { %2167 = vmatmul.mubr.bf16.vlgmr.msra.gmra.mrb[8].mxu1 %v4088_v2 }
 0x223   : > { %2768 = vmatprep.mubr.msk.bf16.mxu1 %vm1128_vm7, %v4070_v14  ;;  %v4279_v26 = vpop.permute.xlu1 %1448  ;;  %vm2302_vm7 = vcmask 195584  }
 0x225   : > { %v4281_v62 = vpop.permute.xlu0 %2208 }
 0x226   : > { %2126 = vmatmul.mubr.bf16.gmra.mrb[12].mxu0 %v4123_v38 }
 0x227   : > { %2359 = vmatprep.mubr.bf16.mxu0 %v3265_v46 }
 0x22a   : > { %2175 = vmatmul.mubr.bf16.gmra.mrb[12].mxu1 %v4123_v38  ;;  %v4285_v16 = vpop.permute.xlu0 %2247 }
 0x22b   : > { %2400 = vmatprep.mubr.bf16.mxu1 %v3265_v46  ;;  %v4283_v2 = vpop.permute.xlu1 %2213 }
 0x22e   : > { %v4301_v0 = vpop.permute.xlu0 %2218 }
 0x22f   : > { %v4297_v52 = vpop.permute.xlu1 %2252 }
 0x2b9   : > { %v2015_v14 = vpop.f32.mrb[0].mxu0  ;;  %v2066_v19 = vpop.f32.mrb[0].mxu1 }
 0x2ba   : > { %v2016_v20 = vadd.f32 %v2015_v14, %v4277_v1  ;;  %v2067_v38 = vadd.f32 %v2066_v19, %v4277_v1  ;;  %v2017_v63 = vpop.f32.mrb[1].mxu0  ;;  %v2068_v27 = vpop.f32.mrb[1].mxu1 }
 0x2bb   : > { %v2018_v59 = vadd.f32 %v2017_v63, %v4277_v1  ;;  %v2069_v60 = vadd.f32 %v2068_v27, %v4277_v1  ;;  %v2019_v4 = vpop.f32.mrb[2].mxu0  ;;  %v2070_v58 = vpop.f32.mrb[2].mxu1 }
 0x2bc   : > { %v2182_v43 = vmax.f32 %v2016_v20, 0.0  ;;  %v2184_v37 = vmax.f32 %v2067_v38, 0.0  ;;  %v2020_v17 = vadd.f32 %v2019_v4, %v4275_v22  ;;  %v2071_v61 = vadd.f32 %v2070_v58, %v4275_v22  ;;  %v2021_v34 = vpop.f32.mrb[3].mxu0  ;;  %v2072_v41 = vpop.f32.mrb[3].mxu1 }
 0x2bd   : > { %v2183_v54 = vmax.f32 %v2018_v59, 0.0  ;;  %v2185_v13 = vmax.f32 %v2069_v60, 0.0  ;;  %v2022_v55 = vadd.f32 %v2021_v34, %v4275_v22  ;;  %v2073_v42 = vadd.f32 %v2072_v41, %v4275_v22  ;;  %v4319_v27 = vpop.permute.xlu1 %2257 }
 0x2be   : > { %v2189_v10 = vmax.f32 %v2020_v17, 0.0  ;;  %v2191_v39 = vmax.f32 %v2071_v61, 0.0  ;;  %v2221_v40 = vmul.f32 %v4281_v62, %v2182_v43  ;;  %v2223_v57 = vmul.f32 %v4281_v62, %v2184_v37 }
 0x2bf   : > { %v2190_v48 = vmax.f32 %v2022_v55, 0.0  ;;  %v2192_v49 = vmax.f32 %v2073_v42, 0.0  ;;  %v2222_v44 = vmul.f32 %v4281_v62, %v2183_v54  ;;  %v2224_v12 = vmul.f32 %v4281_v62, %v2185_v13 }
 0x2c0   : > { %v2228_v23 = vmul.f32 %v4283_v2, %v2189_v10  ;;  %v2260_v53 = vadd.f32 %v4285_v16, %v2221_v40  ;;  %v2230_v5 = vmul.f32 %v4283_v2, %v2191_v39  ;;  %v2262_v50 = vadd.f32 %v4285_v16, %v2223_v57  ;;  %v4333_v10 = vld [vmem:[#allocation12] sm:$0xf] }
 0x2c1   : > { %v2025_v24 = vpop.f32.mrb[4].mxu0  ;;  %v2076_v51 = vpop.f32.mrb[4].mxu1  ;;  %v2229_v8 = vmul.f32 %v4283_v2, %v2190_v48  ;;  %v2261_v56 = vadd.f32 %v4285_v16, %v2222_v44  ;;  %v2231_v18 = vmul.f32 %v4283_v2, %v2192_v49  ;;  %v2263_v31 = vadd.f32 %v4285_v16, %v2224_v12 }
 0x2c2   : > { %v2026_v3 = vadd.f32 %v2025_v24, %v4279_v26  ;;  %v2077_v9 = vadd.f32 %v2076_v51, %v4279_v26  ;;  %v2027_v33 = vpop.f32.mrb[5].mxu0  ;;  %v2078_v15 = vpop.f32.mrb[5].mxu1  ;;  %v2267_v32 = vadd.f32 %v4297_v52, %v2228_v23  ;;  %v2269_v28 = vadd.f32 %v4297_v52, %v2230_v5 }
 0x2c3   : > { %v2028_v11 = vadd.f32 %v2027_v33, %v4279_v26  ;;  %v2079_v25 = vadd.f32 %v2078_v15, %v4279_v26  ;;  %v2268_v36 = vadd.f32 %v4297_v52, %v2229_v8  ;;  %v2270_v6 = vadd.f32 %v4297_v52, %v2231_v18  ;;  %v2029_v30 = vpop.f32.mrb[6].mxu0  ;;  %v2080_v29 = vpop.f32.mrb[6].mxu1 }
 0x2c4   : > { %v2196_v21 = vmax.f32 %v2026_v3, 0.0  ;;  %v2198_v45 = vmax.f32 %v2077_v9, 0.0  ;;  %v2282_v35 = vpack.c.bf16 %v2267_v32, %v2260_v53  ;;  %v2284_v47 = vpack.c.bf16 %v2269_v28, %v2262_v50  ;;  %v2030_v7 = vpop.f32.mrb[7].mxu0  ;;  %v2081_v14 = vpop.f32.mrb[7].mxu1 }
 0x2c5   : > { %v2197_v19 = vmax.f32 %v2028_v11, 0.0  ;;  %v2199_v20 = vmax.f32 %v2079_v25, 0.0  ;;  %v2283_v38 = vpack.c.bf16 %v2268_v36, %v2261_v56  ;;  %v2285_v63 = vpack.c.bf16 %v2270_v6, %v2263_v31 }
 0x2c6   : > { %v2235_v59 = vmul.f32 %v4301_v0, %v2196_v21  ;;  %v2237_v60 = vmul.f32 %v4301_v0, %v2198_v45  ;;  %v3266_v39 = vmov 0.0  }
 0x2c7   : > { %2327 = vmatprep.subr.bf16.mxu0 %v2283_v38  ;;  %2368 = vmatprep.subr.bf16.mxu1 %v2285_v63  ;;  %v2236_v4 = vmul.f32 %v4301_v0, %v2197_v19  ;;  %v2238_v58 = vmul.f32 %v4301_v0, %v2199_v20 }
 0x2c8   : > { %2328 = vmatpush1.bf16.msra.mxu0 %v2282_v35  ;;  %2369 = vmatpush1.bf16.msra.mxu1 %v2284_v47  ;;  %v2274_v43 = vadd.f32 %v4319_v27, %v2235_v59  ;;  %v2276_v37 = vadd.f32 %v4319_v27, %v2237_v60 }
 0x2c9   : > { %v2275_v17 = vadd.f32 %v4319_v27, %v2236_v4  ;;  %v2277_v61 = vadd.f32 %v4319_v27, %v2238_v58 }
 0x2ca   : > { %v2289_v34 = vpack.c.bf16 %v2274_v43, %v2274_v43  ;;  %v2291_v41 = vpack.c.bf16 %v2276_v37, %v2276_v37 }
 0x2cb   : > { %v2290_v54 = vpack.c.bf16 %v2275_v17, %v2275_v17  ;;  %v2292_v13 = vpack.c.bf16 %v2277_v61, %v2277_v61 }
 0x2cc   : > { %v2307_v55 = vsel %vm399_vm0, %v2289_v34, 0  ;;  %v2313_v42 = vsel %vm399_vm0, %v2291_v41, 0 }
 0x2cd   : > { %2769 = vmatprep.subr.msk.bf16.mxu0 %vm399_vm0, %v2290_v54  ;;  %2771 = vmatprep.subr.msk.bf16.mxu1 %vm399_vm0, %v2292_v13 }
 0x2ce   : > { %2330 = vmatpush1.bf16.msra.mxu0 %v2307_v55  ;;  %2371 = vmatpush1.bf16.msra.mxu1 %v2313_v42 }
 0x2cf   : > { %2782 = vmatprep.subr.bf16.mxu1 %v3266_v39 }
 0x2d1   : > { %2770 = vmatmul.mubr.msk.bf16.vlgmr.msra.gmra.mrb[16].mxu0 %vm2302_vm7, %v4333_v10  ;;  %2772 = vmatmul.mubr.msk.bf16.vlgmr.msra.gmra.mrb[16].mxu1 %vm2302_vm7, %v4333_v10 }
 0x2d2   : > { %2786 = vmatprep.mubr.msk.bf16.mxu1 %vm3267_vm12, %v3266_v39  ;;  %2441 = vmatprep.mubr.bf16.mxu0 %v3265_v46 }
 0x2f1   : > { %v2117_v40 = vpop.f32.mrb[8].mxu0 }
 0x2f2   : > { %v2118_v57 = vadd.f32 %v2117_v40, %v4277_v1  ;;  %v2119_v48 = vpop.f32.mrb[9].mxu0 }
 0x2f3   : > { %v2120_v49 = vadd.f32 %v2119_v48, %v4277_v1  ;;  %v2121_v44 = vpop.f32.mrb[10].mxu0 }
 0x2f4   : > { %v2186_v12 = vmax.f32 %v2118_v57, 0.0  ;;  %v2122_v23 = vadd.f32 %v2121_v44, %v4275_v22  ;;  %v2123_v53 = vpop.f32.mrb[11].mxu0 }
 0x2f5   : > { %v2168_v5 = vpop.f32.mrb[8].mxu1  ;;  %v2187_v50 = vmax.f32 %v2120_v49, 0.0  ;;  %v2124_v24 = vadd.f32 %v2123_v53, %v4275_v22 }
 0x2f6   : > { %v2225_v51 = vmul.f32 %v4281_v62, %v2186_v12  ;;  %v2169_v8 = vadd.f32 %v2168_v5, %v4277_v1  ;;  %v2170_v46 = vpop.f32.mrb[9].mxu1  ;;  %v2193_v56 = vmax.f32 %v2122_v23, 0.0 }
 0x2f7   : > { %v2226_v18 = vmul.f32 %v4281_v62, %v2187_v50  ;;  %v2171_v31 = vpop.f32.mrb[10].mxu1  ;;  %v2194_v3 = vmax.f32 %v2124_v24, 0.0 }
 0x2f8   : > { %v2188_v9 = vmax.f32 %v2169_v8, 0.0  ;;  %v2232_v33 = vmul.f32 %v4283_v2, %v2193_v56  ;;  %v2172_v15 = vadd.f32 %v2171_v31, %v4275_v22  ;;  %v2173_v32 = vpop.f32.mrb[11].mxu1  ;;  %v2264_v28 = vadd.f32 %v4285_v16, %v2225_v51 }
 0x2f9   : > { %v2233_v11 = vmul.f32 %v4283_v2, %v2194_v3  ;;  %v2127_v25 = vpop.f32.mrb[12].mxu0  ;;  %v2265_v21 = vadd.f32 %v4285_v16, %v2226_v18 }
 0x2fa   : > { %v2227_v36 = vmul.f32 %v4281_v62, %v2188_v9  ;;  %v2271_v1 = vadd.f32 %v4297_v52, %v2232_v33  ;;  %v2195_v6 = vmax.f32 %v2172_v15, 0.0  ;;  %v2128_v30 = vadd.f32 %v2127_v25, %v4279_v26  ;;  %v2129_v29 = vpop.f32.mrb[13].mxu0 }
 0x2fb   : > { %v2272_v45 = vadd.f32 %v4297_v52, %v2233_v11  ;;  %v2130_v22 = vadd.f32 %v2129_v29, %v4279_v26  ;;  %v2131_v35 = vpop.f32.mrb[14].mxu0 }
 0x2fc   : > { %v2286_v47 = vpack.c.bf16 %v2271_v1, %v2264_v28  ;;  %v2234_v7 = vmul.f32 %v4283_v2, %v2195_v6  ;;  %v2200_v14 = vmax.f32 %v2128_v30, 0.0  ;;  %v2132_v19 = vpop.f32.mrb[15].mxu0  ;;  %v2266_v63 = vadd.f32 %v4285_v16, %v2227_v36 }
 0x2fd   : > { %v2176_v20 = vpop.f32.mrb[12].mxu1  ;;  %v2201_v62 = vmax.f32 %v2130_v22, 0.0  ;;  %v2287_v38 = vpack.c.bf16 %v2272_v45, %v2265_v21 }
 0x2fe   : > { %v2273_v59 = vadd.f32 %v4297_v52, %v2234_v7  ;;  %v2239_v60 = vmul.f32 %v4301_v0, %v2200_v14  ;;  %v2177_v4 = vadd.f32 %v2176_v20, %v4279_v26  ;;  %v2178_v58 = vpop.f32.mrb[13].mxu1 }
 0x2ff   : > { %v2240_v43 = vmul.f32 %v4301_v0, %v2201_v62  ;;  %v2179_v37 = vpop.f32.mrb[14].mxu1  ;;  %2409 = vmatprep.subr.bf16.mxu0 %v2287_v38 }
 0x300   : > { %v2288_v17 = vpack.c.bf16 %v2273_v59, %v2266_v63  ;;  %v2278_v2 = vadd.f32 %v4319_v27, %v2239_v60  ;;  %v2202_v61 = vmax.f32 %v2177_v4, 0.0  ;;  %v2180_v34 = vpop.f32.mrb[15].mxu1  ;;  %2410 = vmatpush1.bf16.msra.mxu0 %v2286_v47 }
 0x301   : > { %v2279_v16 = vadd.f32 %v4319_v27, %v2240_v43 }
 0x302   : > { %v2241_v52 = vmul.f32 %v4301_v0, %v2202_v61  ;;  %2783 = vmatpush3.bf16.msra.mxu1 %v2288_v17  ;;  %v2293_v41 = vpack.c.bf16 %v2278_v2, %v2278_v2  ;;  %v2300_v0 = vpop.permute.xlu0 %2299 }
 0x303   : > { %v2294_v54 = vpack.c.bf16 %v2279_v16, %v2279_v16  ;;  %2784 = vmatprep.subr.bf16.mxu1 %v3266_v39 }
 0x304   : > { %v2280_v26 = vadd.f32 %v4319_v27, %v2241_v52  ;;  %v2319_v13 = vsel %vm399_vm0, %v2293_v41, 0 }
 0x305   : > { %2773 = vmatprep.subr.msk.bf16.mxu0 %vm399_vm0, %v2294_v54 }
 0x306   : > { %v2295_v55 = vpack.c.bf16 %v2280_v26, %v2280_v26  ;;  %2412 = vmatpush1.bf16.msra.mxu0 %v2319_v13 }
 0x308   : > { %v2325_v42 = vsel %vm399_vm0, %v2295_v55, 0 }
 0x309   : > { %2785 = vmatpush3.bf16.msra.mxu1 %v2325_v42  ;;  %2774 = vmatmul.mubr.msk.bf16.vlgmr.msra.gmra.mrb[20].mxu0 %vm2302_vm7, %v4333_v10 }
 0x30c   : > { %2787 = vmatmul.mubr.msk.bf16.vlgmr.msra.gmra.mrb[20].mxu1 %vm2302_vm7, %v4333_v10 }
 0x3a4   : > { %v2361_v39 = vpop.f32.mrb[16].mxu0  ;;  %v2402_v40 = vpop.f32.mrb[16].mxu1 }
 0x3a5   : > { %v2362_v27 = vadd.f32 %v2361_v39, %v2300_v0  ;;  %v2403_v57 = vadd.f32 %v2402_v40, %v2300_v0  ;;  %v2363_v48 = vpop.f32.mrb[17].mxu0  ;;  %v2404_v49 = vpop.f32.mrb[17].mxu1 }
 0x3a6   : > { %v2364_v44 = vadd.f32 %v2363_v48, %v2300_v0  ;;  %v2405_v12 = vadd.f32 %v2404_v49, %v2300_v0  ;;  %v2365_v23 = vpop.f32.mrb[18].mxu0  ;;  %v2406_v53 = vpop.f32.mrb[18].mxu1 }
 0x3a7   : > { %2490 = vst [vmem:[%s377_s28] sm:$0xff] %v2362_v27  ;;  %2492 = vst [vmem:[%s377_s28 + $0x10] sm:$0xff] %v2403_v57  ;;  %v2366_v5 = vpop.f32.mrb[19].mxu0  ;;  %v2407_v50 = vpop.f32.mrb[19].mxu1 }
 0x3a8   : > { %2491 = vst [vmem:[%s377_s28 + $0x8] sm:$0xff] %v2364_v44  ;;  %2493 = vst [vmem:[%s377_s28 + $0x18] sm:$0xff] %v2405_v12 }
 0x3dc   : > { %v2443_v10 = vpop.f32.mrb[20].mxu0 }
 0x3dd   : > { %v2444_v24 = vadd.f32 %v2443_v10, %v2300_v0  ;;  %v2445_v51 = vpop.f32.mrb[21].mxu0 }
 0x3de   : > { %v2446_v8 = vadd.f32 %v2445_v51, %v2300_v0  ;;  %v2447_v46 = vpop.f32.mrb[22].mxu0 }
 0x3df   : > { %v2484_v56 = vpop.f32.mrb[20].mxu1  ;;  %2494 = vst [vmem:[%s377_s28 + $0x20] sm:$0xff] %v2444_v24  ;;  %v2448_v18 = vpop.f32.mrb[23].mxu0 }
 0x3e0   : > { %v2485_v31 = vadd.f32 %v2484_v56, %v2300_v0  ;;  %v2788_v3 = vpop.f32.mrb[21].mxu1  ;;  %2495 = vst [vmem:[%s377_s28 + $0x28] sm:$0xff] %v2446_v8 }
 0x3e1   : > { %v2487_v9 = vpop.f32.mrb[22].mxu1 }
 0x3e2   : > { %2496 = vst [vmem:[%s377_s28 + $0x30] sm:$0xff] %v2485_v31  ;;  %v2789_v33 = vpop.f32.mrb[23].mxu1 }
 0x3e3   : > { %3165 = shalt.err (!%p3162_p3)
}
 0x3e4   : > { %s3166_s21 = scalar_lea.hbm %s4382_s23, 896  ;;  %s3170_s14 = scalar_lea.hbm %s4433_s7, 1792 }
 0x3e5   : > { %p3167_p4 = scmp.ne.s32.totalorder %s4382_s23, %s3166_s21  ;;  %p3171_p8 = scmp.lt.u32.totalorder %s4382_s23, %s4433_s7 }
 0x3e6   : > { %p3172_p6 = scmp.lt.u32.totalorder %s3170_s14, %s3166_s21  ;;  %p3174_p5 = scmp.lt.u32.totalorder %s3166_s21, %s4382_s23 }
 0x3e7   : > { %p3168_p10 = pnand %p3167_p4, %p4519_p9 }
 0x3e8   : > { %p3173_p7 = por %p3172_p6, %p3171_p8 }
 0x3e9   : > { %p3169_p11 = pneg %p3168_p10 }
 0x3ea   : > { %p3175_p12 = por %p3174_p5, %p3173_p7 }
 0x3ec   : > { %p3176_p1 = pnand %p3175_p12, %p3169_p11 }
 0x3ee   : > { %3179 = shalt.err (!%p3176_p1)
}
 0x3ef   : > { %2821 = dma.vmem_to_hbm [thread:$0]  (%p4519_p9), %s4384_s9, 896, %s4382_s23, %s2498_s30  }
 0x3f0 PF: > { %s2524_s1 = sand.u32 1, %s3218_s24   ;;  %p4520_p13 = scmp.ne.s32.totalorder %s4473_s15, 0 }
 0x3f1   : > { %p4521_p0 = scmp.ge.s32.totalorder %s3230_s27, 2  ;;  %s2525_s17 = scalar_lea.sflag [#allocation5], %s2524_s1 }
 0x3f3   : > { %p2847_p2 = pnand %p4521_p0, %p4520_p13 }
 0x3f5   : > { %3213 = dma.done.wait (!%p2847_p2), %s2525_s17, 896  }
 0x3f6   : > { %3215 = vsyncadd (!%p2847_p2), %s2525_s17, 4294966400  ;;  %p23_p3 = scmp.ge.s32.totalorder %s3497_s11, 4   ;;  %s4522_s24 = smov %s3222_s25 }
 0x3f7   : > { %s4523_s25 = smov %s3226_s26  ;;  %s4524_s26 = smov %s3508_s13 }
 0x3f8   : > { %s4525_s27 = smov %s3497_s11  ;;  %25 = sbr.rel (!%p23_p3) target bundleno = 10 (0xa), region = 117 }
 0x3ff   :  { %2530 = vsyncpa [#allocation4], 1 }
 0x400   :  { %2532 = vsyncpa [#allocation4 + $0x1], 1 }
 0x401   :  { %2533 = vsyncpa [#allocation7], 1 }
 0x402   :  { %2534 = vsyncpa [#allocation10], 1 }
 0x403   :  { %2535 = vsyncpa [#allocation13], 1 }
 0x404   :  { %2536 = vsyncpa [#allocation5], 1 }
 0x405   :  { %2538 = vsyncpa [#allocation5 + $0x1], 1 }

</bundles_post_ra>
